<compile_context>
chip_gen: v6e
topology: v6e:2x2x1
jax: 0.10.0
libtpu: 0.0.40
codegen_flags: <defaults>
</compile_context>

<pallas_src>
import functools

import jax
import jax.numpy as jnp
import numpy as np
from jax import lax
from jax.experimental import pallas as pl
from jax.experimental.pallas import tpu as pltpu


def _round_up(x, m):
    return ((x + m - 1) // m) * m


def _choose_p_tile(L, P, d, budget_bytes=4 << 20):
    """Largest protein-axis chunk so one [L, p_tile, 2d] f32 intermediate stays
    under `budget_bytes`; keeps peak kernel VMEM comfortably inside the 32 MiB
    scoped default on every generation (incl. v7x's 64 MiB physical VMEM)."""
    per_row = L * 2 * d * 4
    cap = max(8, (budget_bytes // per_row) // 8 * 8)
    p8 = _round_up(max(P, 1), 8)
    if p8 <= cap:
        return p8                       # no tiling needed; single chunk
    return max(128, (cap // 128) * 128)  # tiling: keep chunk boundaries lane-aligned


def _inter_atom_kernel(lig_ref, prot_ref, cl_ref, cpt_ref, wf_ref, bf_ref,
                       out_l_ref, out_p_ref, *, l_inter, d_th, neg_slope,
                       p_tile):
    f32 = jnp.float32
    Z_L0 = lig_ref[0].astype(f32)          # [L, d]
    Z_P0 = prot_ref[0].astype(f32)         # [Pp, d]  (Pp = padded protein count)
    cL = cl_ref[0]                         # [L, 3]   f32
    cPt = cpt_ref[0]                       # [3, Pp]  f32 (lane-dense over atoms)
    Wf = wf_ref[...]                       # [d, 2d]  bf16 fused [w_l.T | w_p.T]
    bF = bf_ref[...].astype(f32)           # [1, 2d]  fused bias

    L, d = Z_L0.shape
    Pp = Z_P0.shape[0]
    d2 = 2 * d
    n_chunks = Pp // p_tile

    # ---- pairwise distance -> interaction weights, component-wise & lane-dense ----
    dist2 = jnp.zeros((L, Pp), f32)
    for c in range(3):
        dc = cL[:, c:c + 1] - cPt[c:c + 1, :]            # [L,1]-[1,Pp] -> [L,Pp]
        dist2 = dist2 + dc * dc
    dist = jnp.sqrt(dist2)
    mask = (dist <= d_th).astype(f32)
    expt = jnp.exp(d_th - dist) * mask
    weight = expt / (jnp.sum(expt, axis=1, keepdims=True) + 1e-8)    # [L, Pp]

    # Loop-invariant per-chunk weight views (tiny [L, pt, 1]); the slice /
    # expand_dims relayout is paid once, the splat-broadcast multiply stays in
    # the loop — no materialized [L, P, 2d] broadcast slabs.
    w_chunks = [weight[:, c * p_tile:(c + 1) * p_tile][:, :, None]
                for c in range(n_chunks)]

    def leaky(x):
        return jnp.where(x > 0, x, neg_slope * x)

    def iter_body(_, carry):
        Z_L, Z_P = carry                                  # f32 [L,d], [Pp,d]
        s_l = jnp.zeros((L, d), f32)
        s_p_chunks = []
        for c in range(n_chunks):
            Zp_c = Z_P[c * p_tile:(c + 1) * p_tile, :]    # [pt, d]
            # prod[l*pt + p, :] = Z_L[l, :] * Zp_c[p, :]  (f32 VPU).  The
            # reshape is layout-preserving: p_tile % 8 == 0 so each ligand
            # slab is whole sublane tiles — no relayout copy.
            prod = (Z_L[:, None, :] * Zp_c[None, :, :]).reshape(L * p_tile, d)
            # single fused bf16 MXU matmul per chunk, f32 accumulation
            upd = jnp.dot(prod.astype(jnp.bfloat16), Wf,
                          preferred_element_type=f32)      # [L*pt, 2d]
            upd = leaky(upd + bF).reshape(L, p_tile, d2)   # bias: row-splat add
            wc = w_chunks[c]                               # [L, pt, 1]
            # split before weighting/reducing: each element summed exactly once
            s_l = s_l + jnp.sum(wc * upd[..., :d], axis=1)           # [L, d]
            s_p_chunks.append(jnp.sum(wc * upd[..., d:], axis=0))    # [pt, d]
        Z_P_new = (s_p_chunks[0] if n_chunks == 1
                   else jnp.concatenate(s_p_chunks, axis=0))
        return s_l, Z_P_new

    Z_L, Z_P = lax.fori_loop(0, l_inter, iter_body, (Z_L0, Z_P0), unroll=True)
    out_l_ref[0] = Z_L.astype(out_l_ref.dtype)
    out_p_ref[0] = Z_P.astype(out_p_ref.dtype)


def inter_atom_channel(lig_feats, prot_feats, lig_coords, prot_coords,
                       w_l, b_l, w_p, b_p, *, l_inter, d_th, neg_slope=0.2,
                       p_tile=None):
    """Accepts a single complex ([N_L, d], ...) or a batch ([B, N_L, d], ...)."""
    single = lig_feats.ndim == 2
    if single:
        lig_feats, prot_feats = lig_feats[None], prot_feats[None]
        lig_coords, prot_coords = lig_coords[None], prot_coords[None]

    B, L, d = lig_feats.shape
    P = prot_feats.shape[1]

    if p_tile is None:
        p_tile = _choose_p_tile(L, P, d)
    p_tile = int(p_tile)
    P_pad = _round_up(P, p_tile)

    prot_f = prot_feats.astype(jnp.float32)
    prot_c = prot_coords.astype(jnp.float32)
    if P_pad != P:
        # Pad protein atoms with zero features and far-away coordinates: they
        # land outside d_th -> zero interaction weight -> zero contribution.
        # Padded output rows are sliced off below.
        prot_f = jnp.pad(prot_f, ((0, 0), (0, P_pad - P), (0, 0)))
        prot_c = jnp.pad(prot_c, ((0, 0), (0, P_pad - P), (0, 0)),
                         constant_values=1e6)

    cl = lig_coords.astype(jnp.float32)              # [B, L, 3]
    cpt = jnp.swapaxes(prot_c, 1, 2)                 # [B, 3, P_pad] lane-dense atoms

    # Fused Linear weights: y = x @ [w_l.T | w_p.T] + [b_l | b_p]
    # (the column split inside the kernel relies on this ordering)
    wf = jnp.concatenate([w_l.T, w_p.T], axis=1).astype(jnp.bfloat16)     # [d, 2d]
    bf = jnp.concatenate([b_l, b_p], axis=0).reshape(1, 2 * d).astype(jnp.float32)

    kernel = functools.partial(_inter_atom_kernel, l_inter=int(l_inter),
                               d_th=float(d_th), neg_slope=float(neg_slope),
                               p_tile=p_tile)

    out_l, out_p = pl.pallas_call(
        kernel,
        out_shape=(jax.ShapeDtypeStruct((B, L, d), jnp.float32),
                   jax.ShapeDtypeStruct((B, P_pad, d), jnp.float32)),
        grid=(B,),
        in_specs=[
            pl.BlockSpec((1, L, d), lambda b: (b, 0, 0)),
            pl.BlockSpec((1, P_pad, d), lambda b: (b, 0, 0)),
            pl.BlockSpec((1, L, 3), lambda b: (b, 0, 0)),
            pl.BlockSpec((1, 3, P_pad), lambda b: (b, 0, 0)),
            pl.BlockSpec((d, 2 * d), lambda b: (0, 0)),
            pl.BlockSpec((1, 2 * d), lambda b: (0, 0)),
        ],
        out_specs=(pl.BlockSpec((1, L, d), lambda b: (b, 0, 0)),
                   pl.BlockSpec((1, P_pad, d), lambda b: (b, 0, 0))),
        # P-tiling caps peak VMEM well under the 32 MiB scoped default on all
        # generations, so no explicit vmem_limit_bytes is required.
        compiler_params=pltpu.CompilerParams(
            dimension_semantics=("parallel",)),
    )(lig_feats.astype(jnp.float32), prot_f, cl, cpt, wf, bf)

    out_p = out_p[:, :P]
    if single:
        return out_l[0], out_p[0]
    return out_l, out_p


def reference(lig_feats, prot_feats, lig_coords, prot_coords,
              w_l, b_l, w_p, b_p, *, l_inter, d_th, neg_slope=0.2):
    """Pure-JAX f32 mirror of the PyTorch forward pass (single complex)."""
    diff = lig_coords[:, None, :] - prot_coords[None, :, :]
    dist = jnp.linalg.norm(diff, axis=-1)
    mask = (dist <= d_th).astype(jnp.float32)
    expt = jnp.exp(d_th - dist) * mask
    weight = expt / (jnp.sum(expt, axis=1, keepdims=True) + 1e-8)
    leaky = lambda x: jnp.where(x > 0, x, neg_slope * x)
    Z_L, Z_P = lig_feats, prot_feats
    for _ in range(l_inter):
        prod = Z_L[:, None, :] * Z_P[None, :, :]
        upd_l = leaky(prod @ w_l.T + b_l)
        Z_L_new = jnp.sum(weight[:, :, None] * upd_l, axis=1)
        upd_p = leaky(prod @ w_p.T + b_p)
        Z_P_new = jnp.sum(weight.T[:, :, None] * jnp.transpose(upd_p, (1, 0, 2)),
                          axis=1)
        Z_L, Z_P = Z_L_new, Z_P_new
    return Z_L, Z_P


if __name__ == "__main__":
    B, N_L, N_P, d = 2, 8, 16, 32
    l_inter, d_th, neg_slope = 3, 3.0, 0.2

    key = jax.random.PRNGKey(0)
    k1, k2, k3, k4, k5, k6 = jax.random.split(key, 6)

    ligand_feats = jax.random.normal(k1, (B, N_L, d), jnp.float32)
    protein_feats = jax.random.normal(k2, (B, N_P, d), jnp.float32)
    ligand_coords = jax.random.uniform(k3, (B, N_L, 3), jnp.float32, 0.0, 4.0)
    protein_coords = jax.random.uniform(k4, (B, N_P, 3), jnp.float32, 0.0, 4.0)

    # deterministic xavier_normal_ init (gain=1): std = sqrt(2 / (d + d))
    std = float(np.sqrt(2.0 / (d + d)))
    w_l = jax.random.normal(k5, (d, d), jnp.float32) * std
    w_p = jax.random.normal(k6, (d, d), jnp.float32) * std
    b_l = jnp.zeros((d,), jnp.float32)
    b_p = jnp.zeros((d,), jnp.float32)

    # --- main path (single protein chunk) ---
    out_l, out_p = inter_atom_channel(
        ligand_feats, protein_feats, ligand_coords, protein_coords,
        w_l, b_l, w_p, b_p, l_inter=l_inter, d_th=d_th, neg_slope=neg_slope)
    jax.block_until_ready((out_l, out_p))

    for b in range(B):
        ref_l, ref_p = reference(
            ligand_feats[b], protein_feats[b], ligand_coords[b], protein_coords[b],
            w_l, b_l, w_p, b_p, l_inter=l_inter, d_th=d_th, neg_slope=neg_slope)
        # bf16 MXU inputs with f32 accumulation -> bf16-class tolerance
        assert np.allclose(np.asarray(out_l[b]), np.asarray(ref_l),
                           rtol=1e-2, atol=1e-2)
        assert np.allclose(np.asarray(out_p[b]), np.asarray(ref_p),
                           rtol=1e-2, atol=1e-2)

    # --- exercise the protein-axis tiling + padding path (P=13, tile=8 -> 2 chunks) ---
    P_odd = 13
    out_l_t, out_p_t = inter_atom_channel(
        ligand_feats, protein_feats[:, :P_odd], ligand_coords,
        protein_coords[:, :P_odd], w_l, b_l, w_p, b_p,
        l_inter=l_inter, d_th=d_th, neg_slope=neg_slope, p_tile=8)
    jax.block_until_ready((out_l_t, out_p_t))

    for b in range(B):
        ref_l, ref_p = reference(
            ligand_feats[b], protein_feats[b, :P_odd], ligand_coords[b],
            protein_coords[b, :P_odd], w_l, b_l, w_p, b_p,
            l_inter=l_inter, d_th=d_th, neg_slope=neg_slope)
        assert np.allclose(np.asarray(out_l_t[b]), np.asarray(ref_l),
                           rtol=1e-2, atol=1e-2)
        assert np.allclose(np.asarray(out_p_t[b]), np.asarray(ref_p),
                           rtol=1e-2, atol=1e-2)

    print("KERNEL_OK")
</pallas_src>

<mosaic_0001>
module attributes {stable_mosaic.version = 11 : i64} {
  func.func @_inter_atom_kernel(%arg0: i32, %arg1: memref<1x8x32xf32, #tpu.memory_space<vmem>>, %arg2: memref<1x16x32xf32, #tpu.memory_space<vmem>>, %arg3: memref<1x8x3xf32, #tpu.memory_space<vmem>>, %arg4: memref<1x3x16xf32, #tpu.memory_space<vmem>>, %arg5: memref<32x64xbf16, #tpu.memory_space<vmem>>, %arg6: memref<1x64xf32, #tpu.memory_space<vmem>>, %arg7: memref<1x8x32xf32, #tpu.memory_space<vmem>>, %arg8: memref<1x16x32xf32, #tpu.memory_space<vmem>>) attributes {dimension_semantics = [#tpu.dimension_semantics<parallel>], iteration_bounds = array<i64: 2>, scalar_prefetch = 0 : i64, scratch_operands = 0 : i64, tpu.core_type = #tpu.core_type<tc>, window_params = [{transform_indices = @transform_0, window_bounds = array<i64: 1, 8, 32>}, {transform_indices = @transform_1, window_bounds = array<i64: 1, 16, 32>}, {transform_indices = @transform_2, window_bounds = array<i64: 1, 8, 3>}, {transform_indices = @transform_3, window_bounds = array<i64: 1, 3, 16>}, {pipeline_mode = #tpu.pipeline_mode<synchronous>, transform_indices = @transform_4, window_bounds = array<i64: 32, 64>}, {pipeline_mode = #tpu.pipeline_mode<synchronous>, transform_indices = @transform_5, window_bounds = array<i64: 1, 64>}, {transform_indices = @transform_6, window_bounds = array<i64: 1, 8, 32>}, {transform_indices = @transform_7, window_bounds = array<i64: 1, 16, 32>}]} {
    %c0 = arith.constant 0 : index
    %c0_0 = arith.constant 0 : index
    %c0_1 = arith.constant 0 : index
    %0 = vector.load %arg1[%c0, %c0_0, %c0_1] : memref<1x8x32xf32, #tpu.memory_space<vmem>>, vector<1x8x32xf32>
    %1 = vector.shape_cast %0 : vector<1x8x32xf32> to vector<8x32xf32>
    %c0_2 = arith.constant 0 : index
    %c0_3 = arith.constant 0 : index
    %c0_4 = arith.constant 0 : index
    %2 = vector.load %arg2[%c0_2, %c0_3, %c0_4] : memref<1x16x32xf32, #tpu.memory_space<vmem>>, vector<1x16x32xf32>
    %3 = vector.shape_cast %2 : vector<1x16x32xf32> to vector<16x32xf32>
    %c0_5 = arith.constant 0 : index
    %c0_6 = arith.constant 0 : index
    %c0_7 = arith.constant 0 : index
    %4 = vector.load %arg3[%c0_5, %c0_6, %c0_7] : memref<1x8x3xf32, #tpu.memory_space<vmem>>, vector<1x8x3xf32>
    %5 = vector.shape_cast %4 : vector<1x8x3xf32> to vector<8x3xf32>
    %c0_8 = arith.constant 0 : index
    %c0_9 = arith.constant 0 : index
    %c0_10 = arith.constant 0 : index
    %6 = vector.load %arg4[%c0_8, %c0_9, %c0_10] : memref<1x3x16xf32, #tpu.memory_space<vmem>>, vector<1x3x16xf32>
    %7 = vector.shape_cast %6 : vector<1x3x16xf32> to vector<3x16xf32>
    %c0_11 = arith.constant 0 : index
    %c0_12 = arith.constant 0 : index
    %8 = vector.load %arg5[%c0_11, %c0_12] : memref<32x64xbf16, #tpu.memory_space<vmem>>, vector<32x64xbf16>
    %c0_13 = arith.constant 0 : index
    %c0_14 = arith.constant 0 : index
    %9 = vector.load %arg6[%c0_13, %c0_14] : memref<1x64xf32, #tpu.memory_space<vmem>>, vector<1x64xf32>
    %cst = arith.constant 0.000000e+00 : f32
    %10 = vector.broadcast %cst : f32 to vector<8x16xf32>
    %11 = vector.extract_strided_slice %5 {offsets = [0, 0], sizes = [8, 1], strides = [1, 1]} : vector<8x3xf32> to vector<8x1xf32>
    %12 = vector.extract_strided_slice %7 {offsets = [0, 0], sizes = [1, 16], strides = [1, 1]} : vector<3x16xf32> to vector<1x16xf32>
    %13 = vector.broadcast %11 : vector<8x1xf32> to vector<8x16xf32>
    %14 = vector.broadcast %12 : vector<1x16xf32> to vector<8x16xf32>
    %15 = arith.subf %13, %14 : vector<8x16xf32>
    %16 = arith.mulf %15, %15 : vector<8x16xf32>
    %17 = arith.addf %10, %16 : vector<8x16xf32>
    %18 = vector.extract_strided_slice %5 {offsets = [0, 1], sizes = [8, 1], strides = [1, 1]} : vector<8x3xf32> to vector<8x1xf32>
    %19 = vector.extract_strided_slice %7 {offsets = [1, 0], sizes = [1, 16], strides = [1, 1]} : vector<3x16xf32> to vector<1x16xf32>
    %20 = vector.broadcast %18 : vector<8x1xf32> to vector<8x16xf32>
    %21 = vector.broadcast %19 : vector<1x16xf32> to vector<8x16xf32>
    %22 = arith.subf %20, %21 : vector<8x16xf32>
    %23 = arith.mulf %22, %22 : vector<8x16xf32>
    %24 = arith.addf %17, %23 : vector<8x16xf32>
    %25 = vector.extract_strided_slice %5 {offsets = [0, 2], sizes = [8, 1], strides = [1, 1]} : vector<8x3xf32> to vector<8x1xf32>
    %26 = vector.extract_strided_slice %7 {offsets = [2, 0], sizes = [1, 16], strides = [1, 1]} : vector<3x16xf32> to vector<1x16xf32>
    %27 = vector.broadcast %25 : vector<8x1xf32> to vector<8x16xf32>
    %28 = vector.broadcast %26 : vector<1x16xf32> to vector<8x16xf32>
    %29 = arith.subf %27, %28 : vector<8x16xf32>
    %30 = arith.mulf %29, %29 : vector<8x16xf32>
    %31 = arith.addf %24, %30 : vector<8x16xf32>
    %32 = math.sqrt %31 : vector<8x16xf32>
    %cst_15 = arith.constant 3.000000e+00 : f32
    %33 = vector.broadcast %cst_15 : f32 to vector<8x16xf32>
    %34 = arith.cmpf ole, %32, %33 : vector<8x16xf32>
    %35 = arith.extui %34 : vector<8x16xi1> to vector<8x16xi32>
    %36 = arith.sitofp %35 : vector<8x16xi32> to vector<8x16xf32>
    %cst_16 = arith.constant 3.000000e+00 : f32
    %37 = vector.broadcast %cst_16 : f32 to vector<8x16xf32>
    %38 = arith.subf %37, %32 : vector<8x16xf32>
    %39 = math.exp %38 : vector<8x16xf32>
    %40 = arith.mulf %39, %36 : vector<8x16xf32>
    %cst_17 = arith.constant dense<0.000000e+00> : vector<8xf32>
    %41 = vector.multi_reduction <add>, %40, %cst_17 [1] : vector<8x16xf32> to vector<8xf32>
    %42 = vector.shape_cast %41 : vector<8xf32> to vector<8x1xf32>
    %cst_18 = arith.constant 9.99999993E-9 : f32
    %43 = vector.broadcast %cst_18 : f32 to vector<8x1xf32>
    %44 = arith.addf %42, %43 : vector<8x1xf32>
    %45 = vector.broadcast %44 : vector<8x1xf32> to vector<8x16xf32>
    %46 = arith.divf %40, %45 : vector<8x16xf32>
    %47 = vector.shape_cast %46 : vector<8x16xf32> to vector<8x16x1xf32>
    %c0_i32 = arith.constant 0 : i32
    %cst_19 = arith.constant 0.000000e+00 : f32
    %48 = vector.broadcast %cst_19 : f32 to vector<8x32xf32>
    %49 = vector.shape_cast %1 : vector<8x32xf32> to vector<8x1x32xf32>
    %50 = vector.shape_cast %3 : vector<16x32xf32> to vector<1x16x32xf32>
    %51 = vector.broadcast %49 : vector<8x1x32xf32> to vector<8x16x32xf32>
    %52 = vector.broadcast %50 : vector<1x16x32xf32> to vector<8x16x32xf32>
    %53 = arith.mulf %51, %52 : vector<8x16x32xf32>
    %54 = vector.shape_cast %53 : vector<8x16x32xf32> to vector<128x32xf32>
    %55 = arith.truncf %54 : vector<128x32xf32> to vector<128x32xbf16>
    %cst_20 = arith.constant dense<0.000000e+00> : vector<128x64xf32>
    %56 = tpu.matmul %55, %8, %cst_20 {dimension_numbers = #tpu.dot_dimension_numbers<[1], [0], [0], [1], [0, 0, 1, 1], [], []>} : vector<128x32xbf16>, vector<32x64xbf16>, vector<128x64xf32> -> vector<128x64xf32>
    %57 = vector.broadcast %9 : vector<1x64xf32> to vector<128x64xf32>
    %58 = arith.addf %56, %57 : vector<128x64xf32>
    %cst_21 = arith.constant 0.000000e+00 : f32
    %59 = vector.broadcast %cst_21 : f32 to vector<128x64xf32>
    %60 = arith.cmpf ogt, %58, %59 : vector<128x64xf32>
    %cst_22 = arith.constant 2.000000e-01 : f32
    %61 = vector.broadcast %cst_22 : f32 to vector<128x64xf32>
    %62 = arith.mulf %61, %58 : vector<128x64xf32>
    %63 = arith.select %60, %58, %62 : vector<128x64xi1>, vector<128x64xf32>
    %64 = vector.shape_cast %63 : vector<128x64xf32> to vector<8x16x64xf32>
    %65 = vector.extract_strided_slice %64 {offsets = [0, 0, 0], sizes = [8, 16, 32], strides = [1, 1, 1]} : vector<8x16x64xf32> to vector<8x16x32xf32>
    %66 = vector.broadcast %47 : vector<8x16x1xf32> to vector<8x16x32xf32>
    %67 = arith.mulf %66, %65 : vector<8x16x32xf32>
    %cst_23 = arith.constant dense<0.000000e+00> : vector<8x32xf32>
    %68 = vector.multi_reduction <add>, %67, %cst_23 [1] : vector<8x16x32xf32> to vector<8x32xf32>
    %69 = arith.addf %48, %68 : vector<8x32xf32>
    %70 = vector.extract_strided_slice %64 {offsets = [0, 0, 32], sizes = [8, 16, 32], strides = [1, 1, 1]} : vector<8x16x64xf32> to vector<8x16x32xf32>
    %71 = vector.broadcast %47 : vector<8x16x1xf32> to vector<8x16x32xf32>
    %72 = arith.mulf %71, %70 : vector<8x16x32xf32>
    %cst_24 = arith.constant dense<0.000000e+00> : vector<16x32xf32>
    %73 = vector.multi_reduction <add>, %72, %cst_24 [0] : vector<8x16x32xf32> to vector<16x32xf32>
    %c1_i32 = arith.constant 1 : i32
    %cst_25 = arith.constant 0.000000e+00 : f32
    %74 = vector.broadcast %cst_25 : f32 to vector<8x32xf32>
    %75 = vector.shape_cast %69 : vector<8x32xf32> to vector<8x1x32xf32>
    %76 = vector.shape_cast %73 : vector<16x32xf32> to vector<1x16x32xf32>
    %77 = vector.broadcast %75 : vector<8x1x32xf32> to vector<8x16x32xf32>
    %78 = vector.broadcast %76 : vector<1x16x32xf32> to vector<8x16x32xf32>
    %79 = arith.mulf %77, %78 : vector<8x16x32xf32>
    %80 = vector.shape_cast %79 : vector<8x16x32xf32> to vector<128x32xf32>
    %81 = arith.truncf %80 : vector<128x32xf32> to vector<128x32xbf16>
    %cst_26 = arith.constant dense<0.000000e+00> : vector<128x64xf32>
    %82 = tpu.matmul %81, %8, %cst_26 {dimension_numbers = #tpu.dot_dimension_numbers<[1], [0], [0], [1], [0, 0, 1, 1], [], []>} : vector<128x32xbf16>, vector<32x64xbf16>, vector<128x64xf32> -> vector<128x64xf32>
    %83 = vector.broadcast %9 : vector<1x64xf32> to vector<128x64xf32>
    %84 = arith.addf %82, %83 : vector<128x64xf32>
    %cst_27 = arith.constant 0.000000e+00 : f32
    %85 = vector.broadcast %cst_27 : f32 to vector<128x64xf32>
    %86 = arith.cmpf ogt, %84, %85 : vector<128x64xf32>
    %cst_28 = arith.constant 2.000000e-01 : f32
    %87 = vector.broadcast %cst_28 : f32 to vector<128x64xf32>
    %88 = arith.mulf %87, %84 : vector<128x64xf32>
    %89 = arith.select %86, %84, %88 : vector<128x64xi1>, vector<128x64xf32>
    %90 = vector.shape_cast %89 : vector<128x64xf32> to vector<8x16x64xf32>
    %91 = vector.extract_strided_slice %90 {offsets = [0, 0, 0], sizes = [8, 16, 32], strides = [1, 1, 1]} : vector<8x16x64xf32> to vector<8x16x32xf32>
    %92 = vector.broadcast %47 : vector<8x16x1xf32> to vector<8x16x32xf32>
    %93 = arith.mulf %92, %91 : vector<8x16x32xf32>
    %cst_29 = arith.constant dense<0.000000e+00> : vector<8x32xf32>
    %94 = vector.multi_reduction <add>, %93, %cst_29 [1] : vector<8x16x32xf32> to vector<8x32xf32>
    %95 = arith.addf %74, %94 : vector<8x32xf32>
    %96 = vector.extract_strided_slice %90 {offsets = [0, 0, 32], sizes = [8, 16, 32], strides = [1, 1, 1]} : vector<8x16x64xf32> to vector<8x16x32xf32>
    %97 = vector.broadcast %47 : vector<8x16x1xf32> to vector<8x16x32xf32>
    %98 = arith.mulf %97, %96 : vector<8x16x32xf32>
    %cst_30 = arith.constant dense<0.000000e+00> : vector<16x32xf32>
    %99 = vector.multi_reduction <add>, %98, %cst_30 [0] : vector<8x16x32xf32> to vector<16x32xf32>
    %c2_i32 = arith.constant 2 : i32
    %cst_31 = arith.constant 0.000000e+00 : f32
    %100 = vector.broadcast %cst_31 : f32 to vector<8x32xf32>
    %101 = vector.shape_cast %95 : vector<8x32xf32> to vector<8x1x32xf32>
    %102 = vector.shape_cast %99 : vector<16x32xf32> to vector<1x16x32xf32>
    %103 = vector.broadcast %101 : vector<8x1x32xf32> to vector<8x16x32xf32>
    %104 = vector.broadcast %102 : vector<1x16x32xf32> to vector<8x16x32xf32>
    %105 = arith.mulf %103, %104 : vector<8x16x32xf32>
    %106 = vector.shape_cast %105 : vector<8x16x32xf32> to vector<128x32xf32>
    %107 = arith.truncf %106 : vector<128x32xf32> to vector<128x32xbf16>
    %cst_32 = arith.constant dense<0.000000e+00> : vector<128x64xf32>
    %108 = tpu.matmul %107, %8, %cst_32 {dimension_numbers = #tpu.dot_dimension_numbers<[1], [0], [0], [1], [0, 0, 1, 1], [], []>} : vector<128x32xbf16>, vector<32x64xbf16>, vector<128x64xf32> -> vector<128x64xf32>
    %109 = vector.broadcast %9 : vector<1x64xf32> to vector<128x64xf32>
    %110 = arith.addf %108, %109 : vector<128x64xf32>
    %cst_33 = arith.constant 0.000000e+00 : f32
    %111 = vector.broadcast %cst_33 : f32 to vector<128x64xf32>
    %112 = arith.cmpf ogt, %110, %111 : vector<128x64xf32>
    %cst_34 = arith.constant 2.000000e-01 : f32
    %113 = vector.broadcast %cst_34 : f32 to vector<128x64xf32>
    %114 = arith.mulf %113, %110 : vector<128x64xf32>
    %115 = arith.select %112, %110, %114 : vector<128x64xi1>, vector<128x64xf32>
    %116 = vector.shape_cast %115 : vector<128x64xf32> to vector<8x16x64xf32>
    %117 = vector.extract_strided_slice %116 {offsets = [0, 0, 0], sizes = [8, 16, 32], strides = [1, 1, 1]} : vector<8x16x64xf32> to vector<8x16x32xf32>
    %118 = vector.broadcast %47 : vector<8x16x1xf32> to vector<8x16x32xf32>
    %119 = arith.mulf %118, %117 : vector<8x16x32xf32>
    %cst_35 = arith.constant dense<0.000000e+00> : vector<8x32xf32>
    %120 = vector.multi_reduction <add>, %119, %cst_35 [1] : vector<8x16x32xf32> to vector<8x32xf32>
    %121 = arith.addf %100, %120 : vector<8x32xf32>
    %122 = vector.extract_strided_slice %116 {offsets = [0, 0, 32], sizes = [8, 16, 32], strides = [1, 1, 1]} : vector<8x16x64xf32> to vector<8x16x32xf32>
    %123 = vector.broadcast %47 : vector<8x16x1xf32> to vector<8x16x32xf32>
    %124 = arith.mulf %123, %122 : vector<8x16x32xf32>
    %cst_36 = arith.constant dense<0.000000e+00> : vector<16x32xf32>
    %125 = vector.multi_reduction <add>, %124, %cst_36 [0] : vector<8x16x32xf32> to vector<16x32xf32>
    %c0_37 = arith.constant 0 : index
    %c0_38 = arith.constant 0 : index
    %c0_39 = arith.constant 0 : index
    %126 = vector.load %arg7[%c0_37, %c0_38, %c0_39] : memref<1x8x32xf32, #tpu.memory_space<vmem>>, vector<1x8x32xf32>
    %127 = vector.shape_cast %126 : vector<1x8x32xf32> to vector<8x32xf32>
    %128 = vector.shape_cast %121 : vector<8x32xf32> to vector<1x8x32xf32>
    tpu.vector_store %arg7[%c0_37, %c0_38, %c0_39], %128 {strides = array<i32>} : memref<1x8x32xf32, #tpu.memory_space<vmem>>, vector<1x8x32xf32>,
    %c0_40 = arith.constant 0 : index
    %c0_41 = arith.constant 0 : index
    %c0_42 = arith.constant 0 : index
    %129 = vector.load %arg8[%c0_40, %c0_41, %c0_42] : memref<1x16x32xf32, #tpu.memory_space<vmem>>, vector<1x16x32xf32>
    %130 = vector.shape_cast %129 : vector<1x16x32xf32> to vector<16x32xf32>
    %131 = vector.shape_cast %125 : vector<16x32xf32> to vector<1x16x32xf32>
    tpu.vector_store %arg8[%c0_40, %c0_41, %c0_42], %131 {strides = array<i32>} : memref<1x16x32xf32, #tpu.memory_space<vmem>>, vector<1x16x32xf32>,
    return
  }
  func.func @transform_0(%arg0: i32) -> (i32, i32, i32) {
    %c0_i32 = arith.constant 0 : i32
    %c0_i32_0 = arith.constant 0 : i32
    %c0_i32_1 = arith.constant 0 : i32
    return %arg0, %c0_i32, %c0_i32_0 : i32, i32, i32
  }
  func.func @transform_1(%arg0: i32) -> (i32, i32, i32) {
    %c0_i32 = arith.constant 0 : i32
    %c0_i32_0 = arith.constant 0 : i32
    %c0_i32_1 = arith.constant 0 : i32
    return %arg0, %c0_i32, %c0_i32_0 : i32, i32, i32
  }
  func.func @transform_2(%arg0: i32) -> (i32, i32, i32) {
    %c0_i32 = arith.constant 0 : i32
    %c0_i32_0 = arith.constant 0 : i32
    %c0_i32_1 = arith.constant 0 : i32
    return %arg0, %c0_i32, %c0_i32_0 : i32, i32, i32
  }
  func.func @transform_3(%arg0: i32) -> (i32, i32, i32) {
    %c0_i32 = arith.constant 0 : i32
    %c0_i32_0 = arith.constant 0 : i32
    %c0_i32_1 = arith.constant 0 : i32
    return %arg0, %c0_i32, %c0_i32_0 : i32, i32, i32
  }
  func.func @transform_4(%arg0: i32) -> (i32, i32) {
    %c0_i32 = arith.constant 0 : i32
    %c0_i32_0 = arith.constant 0 : i32
    %c0_i32_1 = arith.constant 0 : i32
    return %c0_i32, %c0_i32_0 : i32, i32
  }
  func.func @transform_5(%arg0: i32) -> (i32, i32) {
    %c0_i32 = arith.constant 0 : i32
    %c0_i32_0 = arith.constant 0 : i32
    %c0_i32_1 = arith.constant 0 : i32
    return %c0_i32, %c0_i32_0 : i32, i32
  }
  func.func @transform_6(%arg0: i32) -> (i32, i32, i32) {
    %c0_i32 = arith.constant 0 : i32
    %c0_i32_0 = arith.constant 0 : i32
    %c0_i32_1 = arith.constant 0 : i32
    return %arg0, %c0_i32, %c0_i32_0 : i32, i32, i32
  }
  func.func @transform_7(%arg0: i32) -> (i32, i32, i32) {
    %c0_i32 = arith.constant 0 : i32
    %c0_i32_0 = arith.constant 0 : i32
    %c0_i32_1 = arith.constant 0 : i32
    return %arg0, %c0_i32, %c0_i32_0 : i32, i32, i32
  }
}

</mosaic_0001>

<bundles_post_ra>
// kernel: tpu_custom_call.1
= control target key start
LH: loop header
LB: loop body
LE: loop exit
PB: predicated region body
PF: predicated region fallthrough
CT: control target
= control target key end

     0   :  { %s2869_s0 = inlined_call_operand.hbm [shape: f32[2,8,32], index: 0, kind: input, shape index: {}]   ;;  %s2870_s1 = inlined_call_operand.vmem [shape: f32[2,16,32], index: 1, kind: input, shape index: {}]   ;;  %s2871_s2 = inlined_call_operand.vmem [shape: f32[2,8,3], index: 2, kind: input, shape index: {}]   ;;  %s2872_s3 = inlined_call_operand.vmem [shape: f32[2,3,16], index: 3, kind: input, shape index: {}]   ;;  %s2873_s4 = inlined_call_operand.hbm [shape: bf16[32,64], index: 4, kind: input, shape index: {}]   ;;  %s2874_s5 = inlined_call_operand.vmem [shape: f32[1,64], index: 5, kind: input, shape index: {}]   ;;  %s2875_s6 = inlined_call_operand.hbm [shape: f32[2,8,32], index: 6, kind: output, shape index: {0}]   ;;  %s2876_s7 = inlined_call_operand.hbm [shape: f32[2,16,32], index: 7, kind: output, shape index: {1}]  }
   0x1   :  { %2881 = sst [smem:[#allocation15_spill]] %s2873_s4 }
   0x2   :  { %13 = vsyncpa [#allocation3], 0 }
   0x3   :  { %15 = vsyncpa [#allocation3 + $0x1], 0 }
   0x4   :  { %16 = vsyncpa [#allocation6], 0 }
   0x5   :  { %17 = vsyncpa [#allocation4], 0 }
   0x6   :  { %19 = vsyncpa [#allocation4 + $0x1], 0 }
   0x7   :  { %20 = vsyncpa [#allocation9], 0 }
   0x8   :  { %22 = vsyncpa [#allocation9 + $0x1], 0  ;;  %s2268_s24 = smov 0   ;;  %s2270_s25 = smov 0  }
   0x9   :  { %s2272_s26 = smov 0   ;;  %s2274_s27 = smov 0  }
   0xa LB: > { %s2289_s28 = sadd.s32 4294967295, %s2212_s27   ;;  %s1828_s29 = sadd.s32 4294967294, %s2212_s27   ;;  %s2212_s27 = sphi %s2274_s27, %s2902_s27   ;;  %s2208_s26 = sphi %s2272_s26, %s2901_s26   ;;  %s2204_s25 = sphi %s2270_s25, %s2900_s25   ;;  %s2200_s24 = sphi %s2268_s24, %s2899_s24  }
   0xb   : > { %p48_p0 = scmp.ne.s32.totalorder %s2204_s25, %s2200_s24  ;;  %p2877_p1 = scmp.eq.s32.totalorder %s2289_s28, 0 }
   0xc   : > { %p198_p3 = scmp.eq.s32.totalorder %s1828_s29, 1  ;;  %p1829_p5 = scmp.ge.s32.totalorder %s2212_s27, 1 }
   0xd   : > { %p2298_p4 = por %p2877_p1, %p48_p0  ;;  %p231_p7 = scmp.lt.s32.totalorder %s2212_s27, 3 }
   0xe   : > { %p2303_p6 = por %p198_p3, %p48_p0  ;;  %s2214_s10 = smov [#allocation5]  }
   0xf   : > { %s2882_s30 = scalar_select %p2298_p4, 1, 0 }
  0x10   : > { %s2883_s8 = scalar_select %p2303_p6, 1, 0 }
  0x11   : > { %p2308_p8 = pnand %p1829_p5, %p231_p7  ;;  %s243_s11 = sshll.u32 %s2214_s10, 4  ;;  %s244_s11 = int_to_ptr.vmem [resolvable:$true] %s243_s11 }
  0x12   : > { %s2322_s13 = sadd.s32 1, %s2212_s27   ;;  %s35_s14 = sadd.s32 1, %s2208_s26 }
  0x13   : > { %s2884_s9 = scalar_select %p2308_p8, 1, 0 }
  0x14   : > { %p1984_p9 = pneg %p2308_p8  ;;  %s32_s15 = ssub.s32 %s2212_s27, %s2322_s13 }
  0x15   : > { %s2071_s16 = scalar_lea.vmem %s244_s11, 256  ;;  %p2079_p5 = scmp.lt.s32.totalorder %s244_s11, %s244_s11 }
  0x16   : > { %p2317_p11 = pnand %p1984_p9, %p2877_p1  ;;  %p2072_p13 = scmp.ne.s32.totalorder %s244_s11, %s2071_s16 }
  0x17   : > { %p2080_p7 = scmp.lt.s32.totalorder %s2071_s16, %s2071_s16 }
  0x18   : > { %p2062_p12 = pneg %p2317_p11 }
  0x19   : > { %p2081_p10 = por %p2080_p7, %p2079_p5 }
  0x1a   : > { %p2074_p0 = pnand %p2072_p13, %p2062_p12 }
  0x1c   : > { %p2075_p3 = pneg %p2074_p0 }
  0x1e   : > { %p2082_p2 = pnand %p2081_p10, %p2075_p3 }
  0x20   : > { %2085 = shalt.err (!%p2082_p2)
}
  0x21   : > { %s2215_s17 = smov 64   ;;  %s2216_s18 = smov 4  }
  0x22   : > { %s2886_s4 = sld [smem:[#allocation15_spill]]  ;;  %p33_p9 = scmp.eq.s32.totalorder %s32_s15, 0 }
  0x23   : > { %p42_p12 = scmp.ne.s32.totalorder %s2208_s26, %s2204_s25  ;;  %p43_p10 = scmp.eq.s32.totalorder %s2212_s27, 0 }
  0x24   : > { %p2000_p2 = scmp.lt.s32.totalorder %s2212_s27, 2  ;;  %p2888_p0 = scmp.eq.s32.totalorder %s2289_s28, 1 }
  0x25   : > { %s2339_s21 = scalar_select %p33_p9, %s2208_s26, %s35_s14  }
  0x26   : > { %p44_p13 = por %p43_p10, %p42_p12  ;;  %p2343_p3 = por %p2888_p0, %p42_p12 }
  0x27   : > { %2887 = sst [smem:[#allocation14_spill]] %s2339_s21  ;;  %s260_s23 = sand.u32 1, %s2208_s26  }
  0x28   : > { %1987 = dma.hbm_to_vmem [thread:$0]  (!%p2317_p11), %s2886_s4, 256, %s244_s11, [#allocation6], %s2215_s17, %s2215_s17, %s2216_s18  }
  0x29   : > { %s2889_s22 = scalar_select %p2343_p3, 1, 0 }
  0x2a   : > { %s1833_s29 = sshll.u32 %s2212_s27, 7  ;;  %s1832_s10 = sshll.u32 %s260_s23, 3 }
  0x2b   : > { %s2352_s19 = scalar_lea.hbm %s2869_s0, %s1833_s29  ;;  %s264_s11 = scalar_lea.vmem [#allocation2], %s1832_s10 }
  0x2c   : > { %s271_s14 = sshll.u32 %s264_s11, 4  ;;  %p2354_p11 = pnand %p2000_p2, %p44_p13  ;;  %s272_s14 = int_to_ptr.vmem [resolvable:$true] %s271_s14 }
  0x2d   : > { %s261_s17 = scalar_lea.sflag [#allocation3], %s260_s23  ;;  %s2086_s18 = scalar_lea.hbm %s2352_s19, 128 }
  0x2e   : > { %p2087_p5 = scmp.ne.s32.totalorder %s2352_s19, %s2086_s18  ;;  %p2088_p7 = pneg %p2354_p11 }
  0x2f   : > { %s2091_s12 = scalar_lea.hbm %s2869_s0, 256  ;;  %p2092_p10 = scmp.lt.s32.totalorder %s2352_s19, %s2869_s0 }
  0x30   : > { %p2089_p9 = pnand %p2088_p7, %p2087_p5  ;;  %p2093_p2 = scmp.lt.s32.totalorder %s2091_s12, %s2086_s18 }
  0x32   : > { %p2090_p12 = pneg %p2089_p9  ;;  %p2094_p13 = por %p2093_p2, %p2092_p10 }
  0x34   : > { %p2095_p0 = pnand %p2094_p13, %p2090_p12 }
  0x36   : > { %2098 = shalt.err (!%p2095_p0)
}
  0x37   : > { %s2099_s11 = scalar_lea.vmem %s272_s14, 128  ;;  %s2217_s23 = smov [#allocation2]  }
  0x38   : > { %p2100_p1 = scmp.ne.s32.totalorder %s272_s14, %s2099_s11  ;;  %s2104_s4 = sshll.u32 %s2217_s23, 4  ;;  %s2105_s4 = int_to_ptr.vmem [resolvable:$false] %s2104_s4 }
  0x39   : > { %s2106_s21 = scalar_lea.vmem %s2105_s4, 256  ;;  %p2107_p5 = scmp.lt.s32.totalorder %s272_s14, %s2105_s4 }
  0x3a   : > { %p2102_p6 = pnand %p2100_p1, %p2088_p7  ;;  %p2108_p9 = scmp.lt.s32.totalorder %s2106_s21, %s2099_s11 }
  0x3c   : > { %p2103_p3 = pneg %p2102_p6  ;;  %p2109_p4 = por %p2108_p9, %p2107_p5 }
  0x3e   : > { %p2110_p8 = pnand %p2109_p4, %p2103_p3 }
  0x40   : > { %2113 = shalt.err (!%p2110_p8)
}
  0x41   : > { %1991 = dma.hbm_to_vmem [thread:$0]  (!%p2354_p11), %s2352_s19, 128, %s272_s14, %s261_s17  }
  0x42   : > { %p2891_p12 = scmp.ne.s32.totalorder %s2884_s9, 0 }
  0x43   : > { %s2375_s18 = sand.u32 (!%p2891_p12), 1, %s2204_s25   ;;  %p2892_p1 = scmp.ne.s32.totalorder (!%p2891_p12), %s2882_s30, 0 }
  0x44   : > { %302 = sbr.rel (%p2891_p12) target bundleno = 1431 (0x597), region = 44  ;;  %s1835_s20 = sshll.u32 (!%p2891_p12), %s2375_s18, 3 }
  0x45   : > { %s305_s4 = scalar_lea.sflag (!%p2891_p12), [#allocation3], %s2375_s18  ;;  %s308_s21 = scalar_lea.vmem (!%p2891_p12), [#allocation2], %s1835_s20 }
  0x49   : > { %2183 = dma.done.wait (%p2892_p1), %s305_s4, 128  }
  0x4a   : > { %2185 = vsyncadd (%p2892_p1), %s305_s4, 4294967168  ;;  %p2893_p4 = scmp.eq.s32.totalorder %s2289_s28, 0 }
  0x4c   : > { %2187 = dma.done.wait (%p2893_p4), [#allocation6], 256   ;;  %p2894_p6 = pmov %p2893_p4 }
  0x4d   : > { %p361_p8 = scmp.lt.s32.totalorder %s2289_s28, 1  ;;  %v2218_v0 = vmov 0   ;;  %v2219_v1 = vmov 2   ;;  %v2220_v3 = vmov 1   ;;  %v390_v4 = vlaneseq  ;;  %v2397_v5 = vld [vmem:[#allocation5 + $0x8] sm:$0xff]   ;;  %v2399_v6 = vld [vmem:[#allocation5] sm:$0xff]  }
  0x4e   : > { %2189 = vsyncadd (%p2894_p6), [#allocation6], 4294967040  ;;  %2046 = vset.pattern.permute.xlu0 %v2218_v0  ;;  %2048 = vset.pattern.permute.xlu1 %v2219_v1  ;;  %v375_v7 = vld [vmem:[%s308_s21] sm:$0xff]  ;;  %v2221_v8 = vmov 1966171168   ;;  %vm660_vm0 = vcmask 261120  }
  0x4f   : > { %s2391_s9 = scalar_select %p361_p8, %s2289_s28, 1  ;;  %v531_v9 = vunpack.c.l.s4 %v2221_v8  ;;  %1970 = vmatprep.subr.bf16.mxu1 %v2397_v5  ;;  %1910 = vmatprep.subr.bf16.mxu0 %v2397_v5  ;;  %v2403_v10 = vshrl.u32 %v390_v4, 7  ;;  %v529_v11 = vcombine.high %v375_v7, %v375_v7  ;;  %vm433_vm4 = vcmask 130048  }
  0x50   : > { %1972 = vmatpush3.bf16.msra.mxu1 %v2397_v5  ;;  %1911 = vmatpush3.bf16.msra.mxu0 %v2397_v5  ;;  %s1646_s11 = scalar_lea.sflag [#allocation4], %s2375_s18  ;;  %p2895_p11 = scmp.ne.s32.totalorder %s2889_s22, 0 }
  0x51   : > { %s1841_s19 = sshll.u32 %s2391_s9, 3  ;;  %v532_v12 = vunpack.c.0.s8 %v531_v9  ;;  %s1878_s17 = sshll.u32 %s2391_s9, 4  ;;  %1971 = vmatprep.subr.bf16.mxu1 %v2399_v6  ;;  %1912 = vmatprep.subr.bf16.mxu0 %v2399_v6  ;;  %v2417_v16 = vsub.s32 0, %v2403_v10  ;;  %v414_v61 = vsub.s32 2, %v2403_v10  ;;  %v403_v63 = vsub.s32 1, %v2403_v10 }
  0x52   : > { %s369_s15 = scalar_lea.vmem %s2871_s2, %s1841_s19  ;;  %s365_s16 = scalar_lea.vmem %s2870_s1, %s1878_s17 }
  0x53   : > { %v378_v2 = vld [vmem:[%s369_s15] sm:$0xff]  ;;  %v535_v13 = vsub.s32 %v532_v12, %v2403_v10  ;;  %v377_v22 = vld [vmem:[%s365_s16 + $0x8] sm:$0xff]  ;;  %s1842_s10 = sshll.u32 %s2391_s9, 2  ;;  %s2223_s19 = smov 96  }
  0x54   : > { %387 = vperm.xlu0 %2046, %v378_v2   ;;  %409 = vperm.xlu1 %2048, %v378_v2   ;;  %v376_v21 = vld [vmem:[%s365_s16] sm:$0xff]  ;;  %s373_s4 = scalar_lea.vmem %s2872_s3, %s1842_s10  ;;  %s1873_s15 = sshll.u32 %s2289_s28, 7 }
  0x55   : > { %1973 = vmatpush3.bf16.msra.mxu1 %v2399_v6  ;;  %v543_v14 = vrot.slane %v529_v11, %v535_v13  ;;  %1913 = vmatpush3.bf16.msra.mxu0 %v2399_v6  ;;  %v536_v15 = vrot.slane %v375_v7, %v535_v13  ;;  %v379_v62 = vld [vmem:[%s373_s4] sm:$0x7]  ;;  %s353_s17 = scalar_lea.vmem [#allocation7], %s1835_s20  ;;  %s2797_s10 = scalar_lea.hbm %s2875_s6, %s1873_s15 }
  0x56   : > { %1930 = vmatprep.subr.bf16.mxu1 %v2397_v5  ;;  %1950 = vmatprep.subr.bf16.mxu0 %v2397_v5  ;;  %v393_v0 = vrot.slane %v379_v62, %v2417_v16  ;;  %v404_v4 = vrot.slane %v379_v62, %v403_v63  ;;  %s1664_s29 = sshll.u32 %s353_s17, 4  ;;  %s2224_s20 = smov [#allocation7]   ;;  %s1665_s29 = int_to_ptr.vmem [resolvable:$true] %s1664_s29 }
  0x57   : > { %v545_v17 = vcombine.high %v543_v14, %v543_v14  ;;  %v559_v18 = vrot.slane %v543_v14, %v535_v13  ;;  %v544_v19 = vcombine.high %v536_v15, %v536_v15  ;;  %v552_v20 = vrot.slane %v536_v15, %v535_v13  ;;  %s2114_s23 = scalar_lea.vmem %s1665_s29, 128  ;;  %s2118_s4 = sshll.u32 %s2224_s20, 4  ;;  %s2119_s4 = int_to_ptr.vmem [resolvable:$false] %s2118_s4 }
  0x58   : > { %2047 = vset.pattern.permute.xlu0 %v2220_v3  ;;  %p2115_p3 = scmp.ne.s32.totalorder %s1665_s29, %s2114_s23  ;;  %s2120_s21 = scalar_lea.vmem %s2119_s4, 256 }
  0x59   : > { %398 = vperm.xlu0 %2047, %v378_v2   ;;  %v575_v23 = vcombine.high %v559_v18, %v559_v18  ;;  %v597_v24 = vrot.slane %v559_v18, %v2417_v16  ;;  %v573_v25 = vrot.slane %v545_v17, %v535_v13  ;;  %v574_v26 = vcombine.high %v552_v20, %v552_v20  ;;  %p2121_p2 = scmp.lt.s32.totalorder %s1665_s29, %s2119_s4  ;;  %p2122_p13 = scmp.lt.s32.totalorder %s2120_s21, %s2114_s23 }
  0x5a   : > { %v581_v27 = vrot.slane %v552_v20, %v2417_v16  ;;  %v566_v28 = vrot.slane %v544_v19, %v535_v13  ;;  %v415_v2 = vrot.slane %v379_v62, %v414_v61  ;;  %p2116_p7 = pnand %p2115_p3, %p2895_p11 }
  0x5b   : > { %v626_v29 = vmul.f32 %v597_v24, %v376_v21  ;;  %v627_v30 = vmul.f32 %v597_v24, %v377_v22  ;;  %v601_v31 = vrot.slane %v573_v25, %v2417_v16  ;;  %v605_v32 = vrot.slane %v575_v23, %v2417_v16  ;;  %p2123_p0 = por %p2122_p13, %p2121_p2 }
  0x5c   : > { %v618_v33 = vmul.f32 %v581_v27, %v376_v21  ;;  %v619_v34 = vmul.f32 %v581_v27, %v377_v22  ;;  %v585_v35 = vrot.slane %v566_v28, %v2417_v16  ;;  %v577_v36 = vcombine.high %v573_v25, %v573_v25  ;;  %p2117_p10 = pneg %p2116_p7 }
  0x5d   : > { %2049 = vset.pattern.permute.xlu0 %v2219_v1  ;;  %v638_v37 = vpack.c.bf16 %v627_v30, %v626_v29  ;;  %v628_v38 = vmul.f32 %v601_v31, %v376_v21  ;;  %v629_v39 = vmul.f32 %v601_v31, %v377_v22  ;;  %v630_v40 = vmul.f32 %v605_v32, %v376_v21 }
  0x5e   : > { %v634_v41 = vpack.c.bf16 %v619_v34, %v618_v33  ;;  %v631_v42 = vmul.f32 %v605_v32, %v377_v22  ;;  %v620_v43 = vmul.f32 %v585_v35, %v376_v21  ;;  %v621_v44 = vmul.f32 %v585_v35, %v377_v22  ;;  %p2124_p5 = pnand %p2123_p0, %p2117_p10 }
  0x5f   : > { %1922 = vmatprep.mubr.msk.bf16.mxu1 %vm660_vm0, %v638_v37  ;;  %v639_v45 = vpack.c.bf16 %v629_v39, %v628_v38  ;;  %v609_v46 = vrot.slane %v577_v36, %v2417_v16  ;;  %v589_v47 = vrot.slane %v574_v26, %v2417_v16  ;;  %v576_v48 = vcombine.high %v566_v28, %v566_v28 }
  0x60   : > { %1914 = vmatprep.mubr.msk.bf16.mxu0 %vm660_vm0, %v634_v41  ;;  %v640_v49 = vpack.c.bf16 %v631_v42, %v630_v40  ;;  %v635_v50 = vpack.c.bf16 %v621_v44, %v620_v43  ;;  %v2222_v24 = vmov 0.0   ;;  %v486_v30 = vsub.s32 4, %v2403_v10 }
  0x61   : > { %1923 = vmatmul.mubr.msk.bf16.vlgmr.msra.gmra.mxu1 %vm660_vm0, %v639_v45  ;;  %v632_v51 = vmul.f32 %v609_v46, %v376_v21  ;;  %v633_v52 = vmul.f32 %v609_v46, %v377_v22  ;;  %v622_v53 = vmul.f32 %v589_v47, %v376_v21  ;;  %v623_v54 = vmul.f32 %v589_v47, %v377_v22  ;;  %v2459_v47 = vld [vmem:[%s2874_s5] ss:$0 sm:$0xff] }
  0x62   : > { %1926 = vmatprep.mubr.msk.bf16.mxu1 %vm660_vm0, %v640_v49  ;;  %1915 = vmatmul.mubr.msk.bf16.vlgmr.msra.gmra.mxu0 %vm660_vm0, %v635_v50  ;;  %v593_v55 = vrot.slane %v576_v48, %v2417_v16  ;;  %v508_v35 = vsub.s32 6, %v2403_v10  ;;  %v519_v37 = vsub.s32 7, %v2403_v10  ;;  %v475_v41 = vsub.s32 3, %v2403_v10 }
  0x63   : > { %v636_v56 = vpack.c.bf16 %v623_v54, %v622_v53  ;;  %1931 = vmatpush3.bf16.msra.mxu1 %v2397_v5  ;;  %1951 = vmatpush3.bf16.msra.mxu0 %v2397_v5  ;;  %v641_v59 = vpack.c.bf16 %v633_v52, %v632_v51  ;;  %v497_v42 = vsub.s32 5, %v2403_v10 }
  0x64   : > { %v624_v57 = vmul.f32 %v593_v55, %v376_v21  ;;  %v625_v58 = vmul.f32 %v593_v55, %v377_v22  ;;  %1932 = vmatprep.subr.bf16.mxu1 %v2399_v6  ;;  %1952 = vmatprep.subr.bf16.mxu0 %v2399_v6 }
  0x65   : > { %1918 = vmatprep.mubr.msk.bf16.mxu0 %vm660_vm0, %v636_v56 }
  0x66   : > { %v637_v60 = vpack.c.bf16 %v625_v58, %v624_v57 }
  0x67   : > { %1933 = vmatpush3.bf16.msra.mxu1 %v2399_v6  ;;  %1953 = vmatpush3.bf16.msra.mxu0 %v2399_v6 }
  0x69   : > { %1927 = vmatmul.mubr.msk.bf16.gmra.mxu1 %vm660_vm0, %v641_v59 }
  0x6a   : > { %1919 = vmatmul.mubr.msk.bf16.gmra.mxu0 %vm660_vm0, %v637_v60 }
  0xcf   : > { %v388_v1 = vpop.permute.xlu0 %387  ;;  %v410_v3 = vpop.permute.xlu1 %409 }
  0xd0   : > { %v394_v5 = vsub.f32 %v388_v1, %v393_v0  ;;  %v416_v6 = vsub.f32 %v410_v3, %v415_v2 }
  0xd2   : > { %v395_v9 = vmul.f32 %v394_v5, %v394_v5  ;;  %v417_v12 = vmul.f32 %v416_v6, %v416_v6 }
  0xd4   : > { %v399_v7 = vpop.permute.xlu0 %398 }
  0xd5   : > { %v405_v8 = vsub.f32 %v399_v7, %v404_v4 }
  0xd7   : > { %v406_v11 = vmul.f32 %v405_v8, %v405_v8 }
  0xd9   : > { %v407_v13 = vadd.f32 %v406_v11, %v395_v9 }
  0xdb   : > { %v418_v14 = vadd.f32 %v417_v12, %v407_v13 }
  0xdd   : > { %2053 = vrsqrt.f32 %v418_v14  ;;  %vm421_vm1 = vcmp.eq.f32.partialorder %v418_v14, inf  ;;  %v424_v18 = vand.u32 2147483648, %v418_v14  ;;  %vm423_vm2 = vcmp.eq.f32.partialorder %v418_v14, 0.0 }
  0xea   : > { %v2054_v15 = vpop.eup %2053 }
  0xeb   : > { %v420_v17 = vmul.f32 %v2054_v15, %v418_v14 }
  0xed   : > { %v422_v19 = vsel %vm421_vm1, %v418_v14, %v420_v17  ;;  %vm926_vm1 = vcmask 523520  }
  0xee   : > { %v425_v20 = vsel %vm423_vm2, %v424_v18, %v422_v19 }
  0xef   : > { %v429_v21 = vsub.f32 3.0, %v425_v20  ;;  %vm426_vm3 = vcmp.le.f32.partialorder %v425_v20, 3.0 }
  0xf0   : > { %v1843_v25 = vsel %vm426_vm3, 1.0, %v2222_v24 }
  0xf1   : > { %v430_v22 = vmul.f32 1.442695, %v429_v21 }
  0xf3   : > { %2055 = vpow2.f32 %v430_v22 }
 0x100   : > { %v2056_v23 = vpop.eup %2055 }
 0x101   : > { %v432_v26 = vmul.f32 %v2056_v23, %v1843_v25 }
 0x103   : > { %v434_v27 = vsel %vm433_vm4, %v432_v26, 0.0 }
 0x104   : > { %435 = vadd.xlane.f32.xlu1 %v434_v27 }
 0x121   : > { %v2463_v53 = vpop.f32.mrf.mxu1 }
 0x122   : > { %v1916_v44 = vpop.f32.mrf.mxu0 }
 0x123   : > { %v728_v55 = vadd.f32 %v1916_v44, %v2459_v47  ;;  %v751_v60 = vpop.f32.mrf.mxu1 }
 0x124   : > { %v719_v45 = vpop.f32.mrf.mxu0 }
 0x125   : > { %v720_v49 = vadd.f32 %v2459_v47, %v719_v45  ;;  %vm784_vm7 = vcmp.gt.f32.partialorder %v728_v55, 0.0  ;;  %v1925_v3 = vpop.f32.mrf.mxu1  ;;  %v760_v45 = vadd.f32 %v2463_v53, %v2459_v47 }
 0x126   : > { %v1917_v46 = vpop.f32.mrf.mxu0 }
 0x127   : > { %v798_v51 = vmul.f32 0.2, %v720_v49  ;;  %vm782_vm5 = vcmp.gt.f32.partialorder %v720_v49, 0.0  ;;  %v731_v58 = vadd.f32 %v1917_v46, %v2459_v47  ;;  %v754_v14 = vpop.f32.mrf.mxu1  ;;  %vm792_vm15 = vcmp.gt.f32.partialorder %v760_v45, 0.0 }
 0x128   : > { %v722_v48 = vpop.f32.mrf.mxu0 }
 0x129   : > { %v723_v50 = vadd.f32 %v2459_v47, %v722_v48  ;;  %v814_v57 = vsel %vm782_vm5, %v720_v49, %v798_v51  ;;  %v801_v2 = vmul.f32 0.2, %v731_v58  ;;  %vm785_vm8 = vcmp.gt.f32.partialorder %v731_v58, 0.0  ;;  %v2493_v21 = vpop.f32.mrf.mxu1 }
 0x12a   : > { %v1920_v10 = vpop.f32.mrf.mxu0 }
 0x12b   : > { %v799_v52 = vmul.f32 0.2, %v723_v50  ;;  %vm783_vm6 = vcmp.gt.f32.partialorder %v723_v50, 0.0  ;;  %v817_v12 = vsel %vm785_vm8, %v731_v58, %v801_v2  ;;  %v744_v24 = vadd.f32 %v1920_v10, %v2459_v47 }
 0x12c   : > { %v735_v54 = vpop.f32.mrf.mxu0 }
 0x12d   : > { %v815_v59 = vsel %vm783_vm6, %v723_v50, %v799_v52  ;;  %v736_v11 = vadd.f32 %v2459_v47, %v735_v54  ;;  %vm788_vm11 = vcmp.gt.f32.partialorder %v744_v24, 0.0  ;;  %v763_v52 = vadd.f32 %v1925_v3, %v2459_v47 }
 0x12e   : > { %v1921_v62 = vpop.f32.mrf.mxu0 }
 0x12f   : > { %v802_v17 = vmul.f32 0.2, %v736_v11  ;;  %vm786_vm9 = vcmp.gt.f32.partialorder %v736_v11, 0.0  ;;  %vm793_vm2 = vcmp.gt.f32.partialorder %v763_v52, 0.0  ;;  %v809_v3 = vmul.f32 0.2, %v763_v52 }
 0x130   : > { %v738_v6 = vpop.f32.mrf.mxu0 }
 0x131   : > { %v739_v13 = vadd.f32 %v2459_v47, %v738_v6  ;;  %v818_v27 = vsel %vm786_vm9, %v736_v11, %v802_v17 }
 0x133   : > { %v803_v20 = vmul.f32 0.2, %v739_v13  ;;  %vm787_vm10 = vcmp.gt.f32.partialorder %v739_v13, 0.0 }
 0x18d   : > { %v436_v28 = vpop.xlane.xlu1 %435 }
 0x18e   : > { %v437_v29 = vadd.f32 1e-08, %v436_v28  ;;  %v747_v28 = vadd.f32 %v1921_v62, %v2459_v47 }
 0x190   : > { %2057 = vrcp.f32 %v437_v29  ;;  %v819_v29 = vsel %vm787_vm10, %v739_v13, %v803_v20  ;;  %vm789_vm12 = vcmp.gt.f32.partialorder %v747_v28, 0.0  ;;  %v776_v20 = vadd.f32 %v2493_v21, %v2459_v47 }
 0x192   : > { %vm796_vm6 = vcmp.gt.f32.partialorder %v776_v20, 0.0 }
 0x19d   : > { %v2058_v31 = vpop.eup %2057 }
 0x19e   : > { %v439_v32 = vmul.f32 %v2058_v31, %v432_v26  ;;  %v767_v31 = vpop.f32.mrf.mxu1 }
 0x19f   : > { %v768_v6 = vadd.f32 %v2459_v47, %v767_v31 }
 0x1a0   : > { %v487_v33 = vrot.slane %v439_v32, %v486_v30  ;;  %v443_v34 = vrot.slane %v439_v32, %v2417_v16  ;;  %v509_v36 = vrot.slane %v439_v32, %v508_v35  ;;  %v520_v38 = vrot.slane %v439_v32, %v519_v37 }
 0x1a1   : > { %v454_v39 = vrot.slane %v439_v32, %v403_v63  ;;  %v465_v40 = vrot.slane %v439_v32, %v414_v61  ;;  %v476_v16 = vrot.slane %v439_v32, %v475_v41  ;;  %v498_v43 = vrot.slane %v439_v32, %v497_v42 }
 0x1a2   : > { %489 = vbcast.lane.b32.xlu1 %v487_v33, 256  ;;  %445 = vbcast.lane.b32.xlu0 %v443_v34, 256  ;;  %v800_v63 = vmul.f32 0.2, %v728_v55  ;;  %v752_v30 = vadd.f32 %v2459_v47, %v751_v60  ;;  %v755_v41 = vadd.f32 %v2459_v47, %v754_v14  ;;  %vm794_vm5 = vcmp.gt.f32.partialorder %v768_v6, 0.0 }
 0x1a4   : > { %v816_v9 = vsel %vm784_vm7, %v728_v55, %v800_v63  ;;  %v806_v37 = vmul.f32 0.2, %v752_v30  ;;  %vm790_vm13 = vcmp.gt.f32.partialorder %v752_v30, 0.0  ;;  %v807_v10 = vmul.f32 0.2, %v755_v41 }
 0x1a5   : > { %vm791_vm14 = vcmp.gt.f32.partialorder %v755_v41, 0.0 }
 0x1a6   : > { %515 = vbcast.lane.b32.xlu1 %v509_v36, 264  ;;  %449 = vbcast.lane.b32.xlu0 %v443_v34, 264  ;;  %v822_v49 = vsel %vm790_vm13, %v752_v30, %v806_v37  ;;  %v823_v2 = vsel %vm791_vm14, %v755_v41, %v807_v10  ;;  %v825_v41 = vsel %vm793_vm2, %v763_v52, %v809_v3 }
 0x1aa   : > { %526 = vbcast.lane.b32.xlu1 %v520_v38, 264  ;;  %456 = vbcast.lane.b32.xlu0 %v454_v39, 256 }
 0x1ae   : > { %460 = vbcast.lane.b32.xlu0 %v454_v39, 264 }
 0x1b2   : > { %467 = vbcast.lane.b32.xlu0 %v465_v40, 256 }
 0x1b6   : > { %471 = vbcast.lane.b32.xlu0 %v465_v40, 264 }
 0x1ba   : > { %478 = vbcast.lane.b32.xlu0 %v476_v16, 256 }
 0x1be   : > { %482 = vbcast.lane.b32.xlu0 %v476_v16, 264 }
 0x1c2   : > { %493 = vbcast.lane.b32.xlu0 %v487_v33, 264  ;;  %v804_v33 = vmul.f32 0.2, %v744_v24 }
 0x1c6   : > { %500 = vbcast.lane.b32.xlu0 %v498_v43, 256 }
 0x1ca   : > { %504 = vbcast.lane.b32.xlu0 %v498_v43, 264  ;;  %v820_v43 = vsel %vm788_vm11, %v744_v24, %v804_v33  ;;  %v810_v33 = vmul.f32 0.2, %v768_v6 }
 0x1ce   : > { %511 = vbcast.lane.b32.xlu0 %v509_v36, 256  ;;  %v805_v36 = vmul.f32 0.2, %v747_v28 }
 0x1d0   : > { %v821_v44 = vsel %vm789_vm12, %v747_v28, %v805_v36 }
 0x1d2   : > { %522 = vbcast.lane.b32.xlu0 %v520_v38, 256  ;;  %v1929_v38 = vpop.f32.mrf.mxu1 }
 0x1d3   : > { %v779_v60 = vadd.f32 %v1929_v38, %v2459_v47 }
 0x1d4   : > { %v770_v46 = vpop.f32.mrf.mxu1 }
 0x1d5   : > { %v771_v55 = vadd.f32 %v2459_v47, %v770_v46  ;;  %vm797_vm4 = vcmp.gt.f32.partialorder %v779_v60, 0.0 }
 0x1d7   : > { %vm795_vm3 = vcmp.gt.f32.partialorder %v771_v55, 0.0 }
 0x214   : > { %v2466_v56 = vpop.permute.xlu0 %445  ;;  %v2518_v48 = vpop.permute.xlu1 %489 }
 0x215   : > { %v2470_v61 = vmul.f32 %v814_v57, %v2466_v56  ;;  %v838_v57 = vmul.f32 %v822_v49, %v2518_v48 }
 0x217   : > { %v846_v4 = vsel %vm660_vm0, %v2470_v61, 0.0  ;;  %v882_v11 = vsel %vm660_vm0, %v838_v57, 0.0 }
 0x218   : > { %v2472_v0 = vpop.permute.xlu0 %449 }
 0x219   : > { %v2475_v1 = vmul.f32 %v815_v59, %v2472_v0  ;;  %v808_v59 = vmul.f32 0.2, %v760_v45 }
 0x21b   : > { %v847_v5 = vsel %vm660_vm0, %v2475_v1, 0.0  ;;  %v942_v13 = vsel %vm926_vm1, %v2475_v1, 0.0  ;;  %v927_v1 = vsel %vm926_vm1, %v2470_v61, 0.0  ;;  %v824_v21 = vsel %vm792_vm15, %v760_v45, %v808_v59 }
 0x21c   : > { %v2481_v7 = vadd.f32 %v847_v5, %v846_v4  ;;  %v2483_v8 = vpop.permute.xlu0 %456  ;;  %v826_v59 = vsel %vm794_vm5, %v768_v6, %v810_v33 }
 0x21d   : > { %v2488_v15 = vmul.f32 %v816_v9, %v2483_v8  ;;  %v811_v9 = vmul.f32 0.2, %v771_v55 }
 0x21e   : > { %v849_v33 = vrot.slane %v2481_v7, 4 }
 0x21f   : > { %v855_v22 = vsel %vm660_vm0, %v2488_v15, 0.0  ;;  %v928_v14 = vsel %vm926_vm1, %v2488_v15, 0.0 }
 0x220   : > { %v2490_v18 = vpop.permute.xlu0 %460  ;;  %v929_v30 = vadd.f32 %v928_v14, %v927_v1 }
 0x221   : > { %v833_v19 = vmul.f32 %v817_v12, %v2490_v18  ;;  %v2538_v12 = vpop.permute.xlu1 %515 }
 0x223   : > { %v856_v23 = vsel %vm660_vm0, %v833_v19, 0.0  ;;  %v943_v4 = vsel %vm926_vm1, %v833_v19, 0.0 }
 0x224   : > { %v2499_v25 = vadd.f32 %v856_v23, %v855_v22  ;;  %v2501_v26 = vpop.permute.xlu0 %467  ;;  %v813_v22 = vmul.f32 0.2, %v779_v60  ;;  %v944_v23 = vadd.f32 %v943_v4, %v942_v13 }
 0x225   : > { %v834_v32 = vmul.f32 %v818_v27, %v2501_v26  ;;  %v2561_v38 = vpop.permute.xlu1 %526 }
 0x226   : > { %v829_v61 = vsel %vm797_vm4, %v779_v60, %v813_v22  ;;  %v934_v60 = vsel %vm926_vm1, %v838_v57, 0.0 }
 0x227   : > { %v864_v39 = vsel %vm660_vm0, %v834_v32, 0.0  ;;  %v930_v28 = vsel %vm926_vm1, %v834_v32, 0.0  ;;  %v845_v49 = vmul.f32 %v829_v61, %v2561_v38 }
 0x228   : > { %v2506_v34 = vpop.permute.xlu0 %471 }
 0x229   : > { %v835_v35 = vmul.f32 %v819_v29, %v2506_v34  ;;  %v827_v29 = vsel %vm795_vm3, %v771_v55, %v811_v9  ;;  %v812_v55 = vmul.f32 0.2, %v776_v20 }
 0x22b   : > { %v865_v40 = vsel %vm660_vm0, %v835_v35, 0.0  ;;  %v945_v17 = vsel %vm926_vm1, %v835_v35, 0.0  ;;  %v828_v57 = vsel %vm796_vm6, %v776_v20, %v812_v55  ;;  %v858_v20 = vrot.slane %v2499_v25, 4 }
 0x22c   : > { %v2512_v16 = vadd.f32 %v865_v40, %v864_v39  ;;  %v2514_v42 = vpop.permute.xlu0 %478  ;;  %v946_v31 = vadd.f32 %v945_v17, %v944_v23  ;;  %v931_v39 = vadd.f32 %v930_v28, %v929_v30  ;;  %v955_v17 = vsel %vm926_vm1, %v845_v49, 0.0 }
 0x22d   : > { %v836_v50 = vmul.f32 %v820_v43, %v2514_v42  ;;  %v843_v43 = vmul.f32 %v827_v29, %v2538_v12 }
 0x22f   : > { %v873_v53 = vsel %vm660_vm0, %v836_v50, 0.0  ;;  %v932_v35 = vsel %vm926_vm1, %v836_v50, 0.0 }
 0x230   : > { %v2521_v51 = vpop.permute.xlu0 %482  ;;  %v933_v45 = vadd.f32 %v932_v35, %v931_v39  ;;  %v867_v35 = vrot.slane %v2512_v16, 4 }
 0x231   : > { %v837_v54 = vmul.f32 %v821_v44, %v2521_v51 }
 0x232   : > { %v868_v61 = vadd.f32 %v867_v35, %v2512_v16 }
 0x233   : > { %v874_v58 = vsel %vm660_vm0, %v837_v54, 0.0  ;;  %v947_v15 = vsel %vm926_vm1, %v837_v54, 0.0 }
 0x234   : > { %v2530_v62 = vadd.f32 %v874_v58, %v873_v53  ;;  %v2532_v63 = vpop.permute.xlu0 %493  ;;  %v948_v32 = vadd.f32 %v947_v15, %v946_v31  ;;  %v910_v15 = vsel %vm660_vm0, %v845_v49, 0.0 }
 0x235   : > { %v839_v5 = vmul.f32 %v823_v2, %v2532_v63  ;;  %v953_v2 = vsel %vm926_vm1, %v843_v43, 0.0 }
 0x237   : > { %v883_v19 = vsel %vm660_vm0, %v839_v5, 0.0  ;;  %v949_v36 = vsel %vm926_vm1, %v839_v5, 0.0  ;;  %v935_v5 = vadd.f32 %v934_v60, %v933_v45 }
 0x238   : > { %v2548_v24 = vadd.f32 %v883_v19, %v882_v11  ;;  %v2550_v27 = vpop.permute.xlu0 %500  ;;  %v950_v46 = vadd.f32 %v949_v36, %v948_v32  ;;  %v901_v11 = vsel %vm660_vm0, %v843_v43, 0.0  ;;  %v850_v36 = vadd.f32 %v849_v33, %v2481_v7 }
 0x239   : > { %v840_v37 = vmul.f32 %v824_v21, %v2550_v27  ;;  %v876_v32 = vrot.slane %v2530_v62, 4 }
 0x23a   : > { %v851_v39 = vrot.slane %v850_v36, 2 }
 0x23b   : > { %v891_v50 = vsel %vm660_vm0, %v840_v37, 0.0  ;;  %v936_v3 = vsel %vm926_vm1, %v840_v37, 0.0  ;;  %v859_v37 = vadd.f32 %v858_v20, %v2499_v25 }
 0x23c   : > { %v2563_v40 = vpop.permute.xlu0 %504  ;;  %v937_v19 = vadd.f32 %v936_v3, %v935_v5  ;;  %v852_v45 = vadd.f32 %v851_v39, %v850_v36 }
 0x23d   : > { %v841_v44 = vmul.f32 %v825_v41, %v2563_v40  ;;  %v885_v41 = vrot.slane %v2548_v24, 4  ;;  %v860_v43 = vrot.slane %v859_v37, 2 }
 0x23f   : > { %v892_v10 = vsel %vm660_vm0, %v841_v44, 0.0  ;;  %v951_v54 = vsel %vm926_vm1, %v841_v44, 0.0  ;;  %v869_v44 = vrot.slane %v868_v61, 2  ;;  %v886_v49 = vadd.f32 %v885_v41, %v2548_v24 }
 0x240   : > { %v893_v53 = vadd.f32 %v892_v10, %v891_v50  ;;  %v952_v58 = vadd.f32 %v951_v54, %v950_v46  ;;  %v2572_v52 = vpop.permute.xlu0 %511  ;;  %v877_v46 = vadd.f32 %v876_v32, %v2530_v62  ;;  %v861_v50 = vadd.f32 %v860_v43, %v859_v37 }
 0x241   : > { %v842_v4 = vmul.f32 %v826_v59, %v2572_v52  ;;  %v870_v10 = vadd.f32 %v869_v44, %v868_v61  ;;  %v853_v54 = vrot.slane %v852_v45, 1  ;;  %v887_v55 = vrot.slane %v886_v49, 2 }
 0x242   : > { %v954_v9 = vadd.f32 %v953_v2, %v952_v58  ;;  %v878_v7 = vrot.slane %v877_v46, 2  ;;  %v894_v25 = vrot.slane %v893_v53, 4  ;;  %v862_v58 = vrot.slane %v861_v50, 1 }
 0x243   : > { %v900_v13 = vsel %vm660_vm0, %v842_v4, 0.0  ;;  %v938_v14 = vsel %vm926_vm1, %v842_v4, 0.0  ;;  %v871_v16 = vrot.slane %v870_v10, 1  ;;  %v888_v3 = vadd.f32 %v887_v55, %v886_v49 }
 0x244   : > { %v902_v6 = vadd.f32 %v901_v11, %v900_v13  ;;  %v2582_v22 = vpop.permute.xlu0 %522  ;;  %v956_v23 = vadd.f32 %v955_v17, %v954_v9  ;;  %v939_v28 = vadd.f32 %v938_v14, %v937_v19  ;;  %v879_v2 = vadd.f32 %v878_v7, %v877_v46 }
 0x245   : > { %v844_v1 = vmul.f32 %v828_v57, %v2582_v22  ;;  %v895_v4 = vadd.f32 %v894_v25, %v893_v53  ;;  %v854_v5 = vadd.f32 %v853_v54, %v852_v45  ;;  %v863_v9 = vadd.f32 %v862_v58, %v861_v50 }
 0x246   : > { %961 = vrot.lane.b32.xlu1 %v956_v23, %s2223_s19  ;;  %v903_v59 = vrot.slane %v902_v6, 4  ;;  %v872_v13 = vadd.f32 %v871_v16, %v870_v10  ;;  %v880_v23 = vrot.slane %v879_v2, 1 }
 0x247   : > { %v909_v29 = vsel %vm660_vm0, %v844_v1, 0.0  ;;  %v940_v30 = vsel %vm926_vm1, %v844_v1, 0.0  ;;  %v889_v1 = vrot.slane %v888_v3, 1 }
 0x248   : > { %v911_v31 = vadd.f32 %v910_v15, %v909_v29  ;;  %v941_v21 = vadd.f32 %v940_v30, %v939_v28  ;;  %v904_v11 = vadd.f32 %v903_v59, %v902_v6  ;;  %v896_v28 = vrot.slane %v895_v4, 2 }
 0x249   : > { %v881_v35 = vadd.f32 %v880_v23, %v879_v2  ;;  %v890_v37 = vadd.f32 %v889_v1, %v888_v3 }
 0x24a   : > { %959 = vrot.lane.b32.xlu0 %v941_v21, %s2223_s19  ;;  %v912_v15 = vrot.slane %v911_v31, 4  ;;  %v905_v29 = vrot.slane %v904_v11, 2  ;;  %v897_v20 = vadd.f32 %v896_v28, %v895_v4 }
 0x24c   : > { %v913_v6 = vadd.f32 %v912_v15, %v911_v31  ;;  %v906_v36 = vadd.f32 %v905_v29, %v904_v11  ;;  %v898_v32 = vrot.slane %v897_v20, 1 }
 0x24e   : > { %v914_v41 = vrot.slane %v913_v6, 2  ;;  %v907_v44 = vrot.slane %v906_v36, 1  ;;  %v899_v31 = vadd.f32 %v898_v32, %v897_v20 }
 0x250   : > { %v915_v50 = vadd.f32 %v914_v41, %v913_v6  ;;  %v908_v10 = vadd.f32 %v907_v44, %v906_v36 }
 0x252   : > { %v916_v55 = vrot.slane %v915_v50, 1 }
 0x254   : > { %v917_v2 = vadd.f32 %v916_v55, %v915_v50 }
 0x2b8   : > { %v962_v60 = vpop.permute.xlu1 %961 }
 0x2b9   : > { %v966_v14 = vmul.f32 %v962_v60, %v854_v5  ;;  %v968_v19 = vmul.f32 %v962_v60, %v863_v9  ;;  %v970_v33 = vmul.f32 %v962_v60, %v872_v13  ;;  %v972_v43 = vmul.f32 %v962_v60, %v881_v35 }
 0x2ba   : > { %v974_v45 = vmul.f32 %v962_v60, %v890_v37  ;;  %v976_v25 = vmul.f32 %v962_v60, %v899_v31  ;;  %v978_v58 = vmul.f32 %v962_v60, %v908_v10  ;;  %v980_v4 = vmul.f32 %v962_v60, %v917_v2 }
 0x2bc   : > { %v960_v62 = vpop.permute.xlu0 %959 }
 0x2bd   : > { %v965_v24 = vmul.f32 %v960_v62, %v854_v5  ;;  %v967_v17 = vmul.f32 %v960_v62, %v863_v9  ;;  %v969_v57 = vmul.f32 %v960_v62, %v872_v13  ;;  %v971_v61 = vmul.f32 %v960_v62, %v881_v35 }
 0x2be   : > { %v973_v39 = vmul.f32 %v960_v62, %v890_v37  ;;  %v975_v54 = vmul.f32 %v960_v62, %v899_v31  ;;  %v977_v7 = vmul.f32 %v960_v62, %v908_v10  ;;  %v979_v3 = vmul.f32 %v960_v62, %v917_v2 }
 0x2bf   : > { %v981_v30 = vpack.c.bf16 %v966_v14, %v965_v24  ;;  %v982_v21 = vpack.c.bf16 %v968_v19, %v967_v17  ;;  %v983_v53 = vpack.c.bf16 %v970_v33, %v969_v57  ;;  %v984_v46 = vpack.c.bf16 %v972_v43, %v971_v61 }
 0x2c0   : > { %v985_v49 = vpack.c.bf16 %v974_v45, %v973_v39  ;;  %v986_v16 = vpack.c.bf16 %v976_v25, %v975_v54  ;;  %v987_v59 = vpack.c.bf16 %v978_v58, %v977_v7  ;;  %v988_v5 = vpack.c.bf16 %v980_v4, %v979_v3 }
 0x2c1   : > { %1934 = vmatprep.mubr.msk.bf16.mxu1 %vm660_vm0, %v981_v30 }
 0x2c2   : > { %1935 = vmatmul.mubr.msk.bf16.vlgmr.msra.gmra.mxu1 %vm660_vm0, %v982_v21 }
 0x2c3   : > { %1938 = vmatprep.mubr.msk.bf16.mxu1 %vm660_vm0, %v983_v53 }
 0x2ca   : > { %1939 = vmatmul.mubr.msk.bf16.gmra.mxu1 %vm660_vm0, %v984_v46 }
 0x2cb   : > { %1942 = vmatprep.mubr.msk.bf16.mxu1 %vm660_vm0, %v985_v49 }
 0x2d2   : > { %1943 = vmatmul.mubr.msk.bf16.gmra.mxu1 %vm660_vm0, %v986_v16 }
 0x2d3   : > { %1946 = vmatprep.mubr.msk.bf16.mxu1 %vm660_vm0, %v987_v59 }
 0x2da   : > { %1947 = vmatmul.mubr.msk.bf16.gmra.mxu1 %vm660_vm0, %v988_v5 }
 0x382   : > { %v1936_v9 = vpop.f32.mrf.mxu1 }
 0x383   : > { %v1056_v11 = vadd.f32 %v1936_v9, %v2459_v47 }
 0x384   : > { %v1047_v13 = vpop.f32.mrf.mxu1 }
 0x385   : > { %vm1112_vm7 = vcmp.gt.f32.partialorder %v1056_v11, 0.0  ;;  %v1128_v14 = vmul.f32 0.2, %v1056_v11  ;;  %v1048_v24 = vadd.f32 %v2459_v47, %v1047_v13 }
 0x386   : > { %v1937_v17 = vpop.f32.mrf.mxu1 }
 0x387   : > { %v1144_v19 = vsel %vm1112_vm7, %v1056_v11, %v1128_v14  ;;  %vm1110_vm8 = vcmp.gt.f32.partialorder %v1048_v24, 0.0  ;;  %v1126_v57 = vmul.f32 0.2, %v1048_v24  ;;  %v1059_v23 = vadd.f32 %v1937_v17, %v2459_v47 }
 0x388   : > { %v1050_v1 = vpop.f32.mrf.mxu1  ;;  %v1160_v15 = vmul.f32 %v1144_v19, %v2483_v8 }
 0x389   : > { %v1142_v62 = vsel %vm1110_vm8, %v1048_v24, %v1126_v57  ;;  %vm1113_vm9 = vcmp.gt.f32.partialorder %v1059_v23, 0.0  ;;  %v1129_v60 = vmul.f32 0.2, %v1059_v23  ;;  %v1051_v28 = vadd.f32 %v2459_v47, %v1050_v1 }
 0x38a   : > { %v1940_v29 = vpop.f32.mrf.mxu1  ;;  %v1158_v53 = vmul.f32 %v1142_v62, %v2466_v56  ;;  %v1183_v37 = vsel %vm660_vm0, %v1160_v15, 0.0  ;;  %v1255_v62 = vsel %vm926_vm1, %v1160_v15, 0.0 }
 0x38b   : > { %v1145_v30 = vsel %vm1113_vm9, %v1059_v23, %v1129_v60  ;;  %vm1111_vm10 = vcmp.gt.f32.partialorder %v1051_v28, 0.0  ;;  %v1127_v21 = vmul.f32 0.2, %v1051_v28  ;;  %v1072_v33 = vadd.f32 %v1940_v29, %v2459_v47 }
 0x38c   : > { %v1161_v20 = vmul.f32 %v1145_v30, %v2490_v18  ;;  %v1063_v6 = vpop.f32.mrf.mxu1  ;;  %v1174_v45 = vsel %vm660_vm0, %v1158_v53, 0.0  ;;  %v1254_v14 = vsel %vm926_vm1, %v1158_v53, 0.0 }
 0x38d   : > { %v1143_v35 = vsel %vm1111_vm10, %v1051_v28, %v1127_v21  ;;  %vm1116_vm11 = vcmp.gt.f32.partialorder %v1072_v33, 0.0  ;;  %v1132_v36 = vmul.f32 0.2, %v1072_v33  ;;  %v1064_v32 = vadd.f32 %v2459_v47, %v1063_v6 }
 0x38e   : > { %v1184_v61 = vsel %vm660_vm0, %v1161_v20, 0.0  ;;  %v1159_v39 = vmul.f32 %v1143_v35, %v2472_v0  ;;  %v1941_v41 = vpop.f32.mrf.mxu1  ;;  %v1256_v29 = vadd.f32 %v1255_v62, %v1254_v14  ;;  %v1270_v15 = vsel %vm926_vm1, %v1161_v20, 0.0 }
 0x38f   : > { %v2621_v43 = vadd.f32 %v1184_v61, %v1183_v37  ;;  %v1075_v44 = vadd.f32 %v1941_v41, %v2459_v47  ;;  %v1148_v49 = vsel %vm1116_vm11, %v1072_v33, %v1132_v36  ;;  %vm1114_vm12 = vcmp.gt.f32.partialorder %v1064_v32, 0.0 }
 0x390   : > { %v1175_v46 = vsel %vm660_vm0, %v1159_v39, 0.0  ;;  %v1066_v50 = vpop.f32.mrf.mxu1  ;;  %v1130_v10 = vmul.f32 0.2, %v1064_v32  ;;  %v1164_v55 = vmul.f32 %v1148_v49, %v2514_v42  ;;  %v1269_v53 = vsel %vm926_vm1, %v1159_v39, 0.0 }
 0x391   : > { %v2626_v31 = vadd.f32 %v1175_v46, %v1174_v45  ;;  %vm1117_vm13 = vcmp.gt.f32.partialorder %v1075_v44, 0.0  ;;  %v1133_v54 = vmul.f32 0.2, %v1075_v44  ;;  %v1067_v25 = vadd.f32 %v2459_v47, %v1066_v50 }
 0x392   : > { %v1944_v7 = vpop.f32.mrf.mxu1  ;;  %v1146_v58 = vsel %vm1114_vm12, %v1064_v32, %v1130_v10  ;;  %v1201_v9 = vsel %vm660_vm0, %v1164_v55, 0.0  ;;  %v1259_v50 = vsel %vm926_vm1, %v1164_v55, 0.0 }
 0x393   : > { %v1149_v16 = vsel %vm1117_vm13, %v1075_v44, %v1133_v54  ;;  %v1088_v59 = vadd.f32 %v1944_v7, %v2459_v47  ;;  %vm1115_vm14 = vcmp.gt.f32.partialorder %v1067_v25, 0.0  ;;  %v1131_v4 = vmul.f32 0.2, %v1067_v25 }
 0x394   : > { %v1079_v2 = vpop.f32.mrf.mxu1  ;;  %v1165_v3 = vmul.f32 %v1149_v16, %v2521_v51  ;;  %v1162_v11 = vmul.f32 %v1146_v58, %v2501_v26  ;;  %v1271_v44 = vadd.f32 %v1270_v15, %v1269_v53 }
 0x395   : > { %v1147_v17 = vsel %vm1115_vm14, %v1067_v25, %v1131_v4  ;;  %v1136_v19 = vmul.f32 0.2, %v1088_v59  ;;  %vm1120_vm15 = vcmp.gt.f32.partialorder %v1088_v59, 0.0  ;;  %v1080_v1 = vadd.f32 %v2459_v47, %v1079_v2 }
 0x396   : > { %v1945_v5 = vpop.f32.mrf.mxu1  ;;  %v1202_v13 = vsel %vm660_vm0, %v1165_v3, 0.0  ;;  %v1163_v23 = vmul.f32 %v1147_v17, %v2506_v34  ;;  %v1192_v30 = vsel %vm660_vm0, %v1162_v11, 0.0  ;;  %v1257_v21 = vsel %vm926_vm1, %v1162_v11, 0.0 }
 0x397   : > { %v2636_v24 = vadd.f32 %v1202_v13, %v1201_v9  ;;  %v1091_v60 = vadd.f32 %v1945_v5, %v2459_v47  ;;  %v1152_v35 = vsel %vm1120_vm15, %v1088_v59, %v1136_v19  ;;  %vm1118_vm2 = vcmp.gt.f32.partialorder %v1080_v1, 0.0 }
 0x398   : > { %v1082_v57 = vpop.f32.mrf.mxu1  ;;  %v1193_v33 = vsel %vm660_vm0, %v1163_v23, 0.0  ;;  %v1134_v37 = vmul.f32 0.2, %v1080_v1  ;;  %v1258_v61 = vadd.f32 %v1257_v21, %v1256_v29  ;;  %v1168_v45 = vmul.f32 %v1152_v35, %v2550_v27 }
 0x399   : > { %v2646_v6 = vadd.f32 %v1193_v33, %v1192_v30  ;;  %vm1121_vm3 = vcmp.gt.f32.partialorder %v1091_v60, 0.0  ;;  %v1137_v32 = vmul.f32 0.2, %v1091_v60  ;;  %v1083_v41 = vadd.f32 %v2459_v47, %v1082_v57 }
 0x39a   : > { %v1948_v28 = vpop.f32.mrf.mxu1  ;;  %v1150_v46 = vsel %vm1118_vm2, %v1080_v1, %v1134_v37  ;;  %v1272_v10 = vsel %vm926_vm1, %v1163_v23, 0.0  ;;  %v1260_v16 = vadd.f32 %v1259_v50, %v1258_v61  ;;  %v1219_v5 = vsel %vm660_vm0, %v1168_v45, 0.0 }
 0x39b   : > { %v1104_v49 = vadd.f32 %v1948_v28, %v2459_v47  ;;  %v1166_v54 = vmul.f32 %v1150_v46, %v2518_v48  ;;  %v1153_v7 = vsel %vm1121_vm3, %v1091_v60, %v1137_v32  ;;  %vm1119_vm4 = vcmp.gt.f32.partialorder %v1083_v41, 0.0 }
 0x39c   : > { %v1095_v36 = vpop.f32.mrf.mxu1  ;;  %v1169_v20 = vmul.f32 %v1153_v7, %v2563_v40  ;;  %v1135_v25 = vmul.f32 0.2, %v1083_v41  ;;  %v1273_v4 = vadd.f32 %v1272_v10, %v1271_v44  ;;  %v1274_v13 = vsel %vm926_vm1, %v1165_v3, 0.0 }
 0x39d   : > { %v1096_v58 = vadd.f32 %v2459_v47, %v1095_v36  ;;  %v1261_v59 = vsel %vm926_vm1, %v1166_v54, 0.0  ;;  %vm1124_vm5 = vcmp.gt.f32.partialorder %v1104_v49, 0.0  ;;  %v1140_v2 = vmul.f32 0.2, %v1104_v49 }
 0x39e   : > { %v1949_v39 = vpop.f32.mrf.mxu1  ;;  %v1220_v55 = vsel %vm660_vm0, %v1169_v20, 0.0  ;;  %v1151_v9 = vsel %vm1119_vm4, %v1083_v41, %v1135_v25  ;;  %v1262_v14 = vadd.f32 %v1261_v59, %v1260_v16  ;;  %v1210_v62 = vsel %vm660_vm0, %v1166_v54, 0.0 }
 0x39f   : > { %v2661_v17 = vadd.f32 %v1220_v55, %v1219_v5  ;;  %v1167_v19 = vmul.f32 %v1151_v9, %v2532_v63  ;;  %v1156_v57 = vsel %vm1124_vm5, %v1104_v49, %v1140_v2  ;;  %vm1122_vm6 = vcmp.gt.f32.partialorder %v1096_v58, 0.0 }
 0x3a0   : > { %v1098_v11 = vpop.f32.mrf.mxu1  ;;  %v1138_v23 = vmul.f32 0.2, %v1096_v58  ;;  %v1107_v1 = vadd.f32 %v1949_v39, %v2459_v47  ;;  %v1263_v3 = vsel %vm926_vm1, %v1168_v45, 0.0  ;;  %v1275_v21 = vadd.f32 %v1274_v13, %v1273_v4 }
 0x3a1   : > { %v1211_v60 = vsel %vm660_vm0, %v1167_v19, 0.0  ;;  %v1276_v28 = vsel %vm926_vm1, %v1167_v19, 0.0  ;;  %v1099_v29 = vadd.f32 %v2459_v47, %v1098_v11  ;;  %v1172_v53 = vmul.f32 %v1156_v57, %v2582_v22 }
 0x3a2   : > { %v1212_v30 = vadd.f32 %v1211_v60, %v1210_v62  ;;  %v1154_v33 = vsel %vm1122_vm6, %v1096_v58, %v1138_v23  ;;  %vm1125_vm7 = vcmp.gt.f32.partialorder %v1107_v1, 0.0  ;;  %v1141_v36 = vmul.f32 0.2, %v1107_v1 }
 0x3a3   : > { %v1170_v35 = vmul.f32 %v1154_v33, %v2572_v52  ;;  %v1277_v37 = vadd.f32 %v1276_v28, %v1275_v21  ;;  %vm1123_vm8 = vcmp.gt.f32.partialorder %v1099_v29, 0.0  ;;  %v1139_v15 = vmul.f32 0.2, %v1099_v29 }
 0x3a4   : > { %v1264_v61 = vadd.f32 %v1263_v3, %v1262_v14  ;;  %v1157_v32 = vsel %vm1125_vm7, %v1107_v1, %v1141_v36  ;;  %v1278_v49 = vsel %vm926_vm1, %v1169_v20, 0.0  ;;  %v1267_v50 = vsel %vm926_vm1, %v1172_v53, 0.0 }
 0x3a5   : > { %v1265_v41 = vsel %vm926_vm1, %v1170_v35, 0.0  ;;  %v1173_v44 = vmul.f32 %v1157_v32, %v2561_v38  ;;  %v1155_v46 = vsel %vm1123_vm8, %v1099_v29, %v1139_v15  ;;  %v1237_v10 = vsel %vm660_vm0, %v1172_v53, 0.0 }
 0x3a6   : > { %v1266_v45 = vadd.f32 %v1265_v41, %v1264_v61  ;;  %v1171_v39 = vmul.f32 %v1155_v46, %v2538_v12  ;;  %v1279_v25 = vadd.f32 %v1278_v49, %v1277_v37  ;;  %v1228_v58 = vsel %vm660_vm0, %v1170_v35, 0.0 }
 0x3a7   : > { %v1238_v54 = vsel %vm660_vm0, %v1173_v44, 0.0  ;;  %v1282_v5 = vsel %vm926_vm1, %v1173_v44, 0.0  ;;  %v1177_v9 = vrot.slane %v2626_v31, 4  ;;  %v1186_v11 = vrot.slane %v2621_v43, 4 }
 0x3a8   : > { %v1268_v7 = vadd.f32 %v1267_v50, %v1266_v45  ;;  %v1239_v16 = vadd.f32 %v1238_v54, %v1237_v10  ;;  %v1229_v59 = vsel %vm660_vm0, %v1171_v39, 0.0  ;;  %v1280_v2 = vsel %vm926_vm1, %v1171_v39, 0.0 }
 0x3a9   : > { %v1230_v4 = vadd.f32 %v1229_v59, %v1228_v58  ;;  %v1281_v20 = vadd.f32 %v1280_v2, %v1279_v25  ;;  %v1195_v13 = vrot.slane %v2646_v6, 4  ;;  %v1178_v14 = vadd.f32 %v1177_v9, %v2626_v31 }
 0x3aa   : > { %1286 = vrot.lane.b32.xlu0 %v1268_v7, %s2223_s19  ;;  %v1187_v19 = vadd.f32 %v1186_v11, %v2621_v43  ;;  %v1204_v1 = vrot.slane %v2636_v24, 4  ;;  %v1213_v62 = vrot.slane %v1212_v30, 4  ;;  %v1222_v36 = vrot.slane %v2661_v17, 4 }
 0x3ab   : > { %v1283_v55 = vadd.f32 %v1282_v5, %v1281_v20  ;;  %v1196_v57 = vadd.f32 %v1195_v13, %v2646_v6  ;;  %v1179_v23 = vrot.slane %v1178_v14, 2  ;;  %v1231_v15 = vrot.slane %v1230_v4, 4 }
 0x3ac   : > { %v1188_v60 = vrot.slane %v1187_v19, 2  ;;  %v1205_v3 = vadd.f32 %v1204_v1, %v2636_v24  ;;  %v1214_v21 = vadd.f32 %v1213_v62, %v1212_v30  ;;  %v1223_v41 = vadd.f32 %v1222_v36, %v2661_v17 }
 0x3ad   : > { %1288 = vrot.lane.b32.xlu1 %v1283_v55, %s2223_s19  ;;  %v1197_v28 = vrot.slane %v1196_v57, 2  ;;  %v1180_v29 = vadd.f32 %v1179_v23, %v1178_v14  ;;  %v1232_v49 = vadd.f32 %v1231_v15, %v1230_v4  ;;  %v1240_v58 = vrot.slane %v1239_v16, 4 }
 0x3ae   : > { %v1189_v33 = vadd.f32 %v1188_v60, %v1187_v19  ;;  %v1206_v35 = vrot.slane %v1205_v3, 2  ;;  %v1215_v31 = vrot.slane %v1214_v21, 2  ;;  %v1224_v25 = vrot.slane %v1223_v41, 2 }
 0x3af   : > { %v1198_v53 = vadd.f32 %v1197_v28, %v1196_v57  ;;  %v1181_v37 = vrot.slane %v1180_v29, 1  ;;  %v1233_v20 = vrot.slane %v1232_v49, 2  ;;  %v1241_v4 = vadd.f32 %v1240_v58, %v1239_v16 }
 0x3b0   : > { %v1190_v43 = vrot.slane %v1189_v33, 1  ;;  %v1207_v32 = vadd.f32 %v1206_v35, %v1205_v3  ;;  %v1216_v44 = vadd.f32 %v1215_v31, %v1214_v21  ;;  %v1225_v11 = vadd.f32 %v1224_v25, %v1223_v41 }
 0x3b1   : > { %v1199_v6 = vrot.slane %v1198_v53, 1  ;;  %v1182_v46 = vadd.f32 %v1181_v37, %v1180_v29  ;;  %v1234_v14 = vadd.f32 %v1233_v20, %v1232_v49  ;;  %v1242_v1 = vrot.slane %v1241_v4, 2 }
 0x3b2   : > { %v1191_v45 = vadd.f32 %v1190_v43, %v1189_v33  ;;  %v1208_v59 = vrot.slane %v1207_v32, 1  ;;  %v1217_v2 = vrot.slane %v1216_v44, 1  ;;  %v1226_v60 = vrot.slane %v1225_v11, 1 }
 0x3b3   : > { %v1200_v24 = vadd.f32 %v1199_v6, %v1198_v53  ;;  %v1235_v29 = vrot.slane %v1234_v14, 1  ;;  %v1243_v33 = vadd.f32 %v1242_v1, %v1241_v4 }
 0x3b4   : > { %v1209_v13 = vadd.f32 %v1208_v59, %v1207_v32  ;;  %v1218_v19 = vadd.f32 %v1217_v2, %v1216_v44  ;;  %v1227_v16 = vadd.f32 %v1226_v60, %v1225_v11 }
 0x3b5   : > { %v1236_v53 = vadd.f32 %v1235_v29, %v1234_v14  ;;  %v1244_v37 = vrot.slane %v1243_v33, 1 }
 0x3b7   : > { %v1245_v32 = vadd.f32 %v1244_v37, %v1243_v33 }
 0x41c   : > { %v1287_v61 = vpop.permute.xlu0 %1286 }
 0x41d   : > { %v1292_v39 = vmul.f32 %v1287_v61, %v1182_v46  ;;  %v1294_v10 = vmul.f32 %v1287_v61, %v1191_v45  ;;  %v1296_v9 = vmul.f32 %v1287_v61, %v1200_v24  ;;  %v1298_v62 = vmul.f32 %v1287_v61, %v1209_v13 }
 0x41e   : > { %v1300_v28 = vmul.f32 %v1287_v61, %v1218_v19  ;;  %v1302_v31 = vmul.f32 %v1287_v61, %v1227_v16  ;;  %v1304_v43 = vmul.f32 %v1287_v61, %v1236_v53  ;;  %v1306_v44 = vmul.f32 %v1287_v61, %v1245_v32 }
 0x41f   : > { %v1289_v30 = vpop.permute.xlu1 %1288 }
 0x420   : > { %v1293_v50 = vmul.f32 %v1289_v30, %v1182_v46  ;;  %v1295_v54 = vmul.f32 %v1289_v30, %v1191_v45  ;;  %v1297_v7 = vmul.f32 %v1289_v30, %v1200_v24  ;;  %v1299_v57 = vmul.f32 %v1289_v30, %v1209_v13 }
 0x421   : > { %v1301_v23 = vmul.f32 %v1289_v30, %v1218_v19  ;;  %v1303_v35 = vmul.f32 %v1289_v30, %v1227_v16  ;;  %v1305_v36 = vmul.f32 %v1289_v30, %v1236_v53  ;;  %v1307_v41 = vmul.f32 %v1289_v30, %v1245_v32 }
 0x422   : > { %v1308_v5 = vpack.c.bf16 %v1293_v50, %v1292_v39  ;;  %v1309_v55 = vpack.c.bf16 %v1295_v54, %v1294_v10  ;;  %v1310_v17 = vpack.c.bf16 %v1297_v7, %v1296_v9  ;;  %v1311_v3 = vpack.c.bf16 %v1299_v57, %v1298_v62 }
 0x423   : > { %v1312_v21 = vpack.c.bf16 %v1301_v23, %v1300_v28  ;;  %v1313_v15 = vpack.c.bf16 %v1303_v35, %v1302_v31  ;;  %v1314_v6 = vpack.c.bf16 %v1305_v36, %v1304_v43  ;;  %v1315_v46 = vpack.c.bf16 %v1307_v41, %v1306_v44  ;;  %v2717_v23 = vld [vmem:[%s2874_s5] ss:$0 sm:$0xff] }
 0x424   : > { %1954 = vmatprep.mubr.msk.bf16.mxu0 %vm660_vm0, %v1308_v5 }
 0x425   : > { %1955 = vmatmul.mubr.msk.bf16.vlgmr.msra.gmra.mxu0 %vm660_vm0, %v1309_v55 }
 0x426   : > { %1958 = vmatprep.mubr.msk.bf16.mxu0 %vm660_vm0, %v1310_v17 }
 0x42d   : > { %1959 = vmatmul.mubr.msk.bf16.gmra.mxu0 %vm660_vm0, %v1311_v3 }
 0x42e   : > { %1962 = vmatprep.mubr.msk.bf16.mxu0 %vm660_vm0, %v1312_v21 }
 0x435   : > { %1963 = vmatmul.mubr.msk.bf16.gmra.mxu0 %vm660_vm0, %v1313_v15 }
 0x436   : > { %1966 = vmatprep.mubr.msk.bf16.mxu0 %vm660_vm0, %v1314_v6 }
 0x43d   : > { %1967 = vmatmul.mubr.msk.bf16.gmra.mxu0 %vm660_vm0, %v1315_v46 }
 0x4e5   : > { %v1956_v45 = vpop.f32.mrf.mxu0 }
 0x4e6   : > { %v1383_v49 = vadd.f32 %v1956_v45, %v2459_v47 }
 0x4e7   : > { %v1374_v24 = vpop.f32.mrf.mxu0 }
 0x4e8   : > { %vm1439_vm9 = vcmp.gt.f32.partialorder %v1383_v49, 0.0  ;;  %v1455_v39 = vmul.f32 0.2, %v1383_v49  ;;  %v1375_v50 = vadd.f32 %v2459_v47, %v1374_v24 }
 0x4e9   : > { %v1957_v10 = vpop.f32.mrf.mxu0 }
 0x4ea   : > { %v1471_v54 = vsel %vm1439_vm9, %v1383_v49, %v1455_v39  ;;  %vm1437_vm10 = vcmp.gt.f32.partialorder %v1375_v50, 0.0  ;;  %v1453_v7 = vmul.f32 0.2, %v1375_v50  ;;  %v1386_v25 = vadd.f32 %v1957_v10, %v2459_v47 }
 0x4eb   : > { %v1377_v58 = vpop.f32.mrf.mxu0  ;;  %v1487_v2 = vmul.f32 %v1471_v54, %v2483_v8 }
 0x4ec   : > { %v1469_v30 = vsel %vm1437_vm10, %v1375_v50, %v1453_v7  ;;  %vm1440_vm11 = vcmp.gt.f32.partialorder %v1386_v25, 0.0  ;;  %v1456_v61 = vmul.f32 0.2, %v1386_v25  ;;  %v1378_v59 = vadd.f32 %v2459_v47, %v1377_v58 }
 0x4ed   : > { %v1960_v20 = vpop.f32.mrf.mxu0  ;;  %v1485_v17 = vmul.f32 %v1469_v30, %v2466_v56  ;;  %v1510_v19 = vsel %vm660_vm0, %v1487_v2, 0.0  ;;  %v1582_v30 = vsel %vm926_vm1, %v1487_v2, 0.0 }
 0x4ee   : > { %v1472_v5 = vsel %vm1440_vm11, %v1386_v25, %v1456_v61  ;;  %vm1438_vm12 = vcmp.gt.f32.partialorder %v1378_v59, 0.0  ;;  %v1454_v55 = vmul.f32 0.2, %v1378_v59  ;;  %v1399_v9 = vadd.f32 %v1960_v20, %v2459_v47 }
 0x4ef   : > { %v1488_v11 = vmul.f32 %v1472_v5, %v2490_v18  ;;  %v1390_v4 = vpop.f32.mrf.mxu0  ;;  %v1501_v62 = vsel %vm660_vm0, %v1485_v17, 0.0  ;;  %v1581_v49 = vsel %vm926_vm1, %v1485_v17, 0.0  ;;  %vm1619_vm11 = vcmask 1041409  }
 0x4f0   : > { %v1470_v13 = vsel %vm1438_vm12, %v1378_v59, %v1454_v55  ;;  %vm1443_vm13 = vcmp.gt.f32.partialorder %v1399_v9, 0.0  ;;  %v1459_v14 = vmul.f32 0.2, %v1399_v9  ;;  %v1391_v47 = vadd.f32 %v2717_v23, %v1390_v4 }
 0x4f1   : > { %v1511_v57 = vsel %vm660_vm0, %v1488_v11, 0.0  ;;  %v1486_v8 = vmul.f32 %v1470_v13, %v2472_v0  ;;  %v1961_v56 = vpop.f32.mrf.mxu0  ;;  %v1583_v55 = vadd.f32 %v1582_v30, %v1581_v49  ;;  %vm1621_vm12 = vcmask 1042434  }
 0x4f2   : > { %v1512_v1 = vadd.f32 %v1511_v57, %v1510_v19  ;;  %v1402_v18 = vadd.f32 %v2717_v23, %v1961_v56  ;;  %v1475_v28 = vsel %vm1443_vm13, %v1399_v9, %v1459_v14  ;;  %vm1441_vm14 = vcmp.gt.f32.partialorder %v1391_v47, 0.0 }
 0x4f3   : > { %v1502_v60 = vsel %vm660_vm0, %v1486_v8, 0.0  ;;  %v1393_v29 = vpop.f32.mrf.mxu0  ;;  %v1457_v21 = vmul.f32 0.2, %v1391_v47  ;;  %v1491_v35 = vmul.f32 %v1475_v28, %v2514_v42  ;;  %v1596_v42 = vsel %vm926_vm1, %v1486_v8, 0.0 }
 0x4f4   : > { %v1513_v3 = vrot.slane %v1512_v1, 4  ;;  %v1503_v0 = vadd.f32 %v1502_v60, %v1501_v62  ;;  %vm1444_vm15 = vcmp.gt.f32.partialorder %v1402_v18, 0.0  ;;  %v1460_v33 = vmul.f32 0.2, %v1402_v18 }
 0x4f5   : > { %v1964_v16 = vpop.f32.mrf.mxu0  ;;  %v1473_v36 = vsel %vm1441_vm14, %v1391_v47, %v1457_v21  ;;  %v1394_v31 = vadd.f32 %v2717_v23, %v1393_v29  ;;  %v1528_v24 = vsel %vm660_vm0, %v1491_v35, 0.0  ;;  %v1597_v9 = vsel %vm926_vm1, %v1488_v11, 0.0 }
 0x4f6   : > { %v1504_v53 = vrot.slane %v1503_v0, 4  ;;  %v1514_v37 = vadd.f32 %v1513_v3, %v1512_v1  ;;  %v1476_v43 = vsel %vm1444_vm15, %v1402_v18, %v1460_v33  ;;  %v1415_v15 = vadd.f32 %v2717_v23, %v1964_v16 }
 0x4f7   : > { %v1406_v6 = vpop.f32.mrf.mxu0  ;;  %v1492_v41 = vmul.f32 %v1476_v43, %v2521_v51  ;;  %vm1442_vm2 = vcmp.gt.f32.partialorder %v1394_v31, 0.0  ;;  %v1489_v44 = vmul.f32 %v1473_v36, %v2501_v26  ;;  %v1458_v46 = vmul.f32 0.2, %v1394_v31 }
 0x4f8   : > { %v1505_v32 = vadd.f32 %v1504_v53, %v1503_v0  ;;  %v1515_v50 = vrot.slane %v1514_v37, 2  ;;  %v1463_v7 = vmul.f32 0.2, %v1415_v15  ;;  %vm1447_vm3 = vcmp.gt.f32.partialorder %v1415_v15, 0.0 }
 0x4f9   : > { %v1965_v45 = vpop.f32.mrf.mxu0  ;;  %v1529_v39 = vsel %vm660_vm0, %v1492_v41, 0.0  ;;  %v1474_v54 = vsel %vm1442_vm2, %v1394_v31, %v1458_v46  ;;  %v1407_v26 = vadd.f32 %v2717_v23, %v1406_v6  ;;  %v1584_v61 = vsel %vm926_vm1, %v1489_v44, 0.0 }
 0x4fa   : > { %v1530_v10 = vadd.f32 %v1529_v39, %v1528_v24  ;;  %v1506_v58 = vrot.slane %v1505_v32, 2  ;;  %v1490_v51 = vmul.f32 %v1474_v54, %v2506_v34  ;;  %v1418_v20 = vadd.f32 %v2717_v23, %v1965_v45 }
 0x4fb   : > { %v1409_v25 = vpop.f32.mrf.mxu0  ;;  %v1519_v17 = vsel %vm660_vm0, %v1489_v44, 0.0  ;;  %v2740_v13 = vadd.f32 %v1515_v50, %v1514_v37  ;;  %v1598_v34 = vadd.f32 %v1597_v9, %v1596_v42  ;;  %v1479_v19 = vsel %vm1447_vm3, %v1415_v15, %v1463_v7 }
 0x4fc   : > { %v1531_v59 = vrot.slane %v1530_v10, 4  ;;  %v1520_v4 = vsel %vm660_vm0, %v1490_v51, 0.0  ;;  %v2742_v57 = vadd.f32 %v1506_v58, %v1505_v32  ;;  %v1585_v2 = vadd.f32 %v1584_v61, %v1583_v55 }
 0x4fd   : > { %v1968_v5 = vpop.f32.mrf.mxu0  ;;  %v1521_v14 = vadd.f32 %v1520_v4, %v1519_v17  ;;  %vm1445_vm4 = vcmp.gt.f32.partialorder %v1407_v26, 0.0  ;;  %v1461_v8 = vmul.f32 0.2, %v1407_v26  ;;  %v1599_v1 = vsel %vm926_vm1, %v1490_v51, 0.0 }
 0x4fe   : > { %v2744_v47 = vadd.f32 %v1531_v59, %v1530_v10  ;;  %vm1448_vm5 = vcmp.gt.f32.partialorder %v1418_v20, 0.0  ;;  %v1495_v18 = vmul.f32 %v1479_v19, %v2550_v27  ;;  %v1464_v60 = vmul.f32 0.2, %v1418_v20 }
 0x4ff   : > { %v1522_v56 = vrot.slane %v1521_v14, 4  ;;  %v1422_v11 = vpop.f32.mrf.mxu0  ;;  %v1477_v62 = vsel %vm1445_vm4, %v1407_v26, %v1461_v8  ;;  %v1410_v28 = vadd.f32 %v2717_v23, %v1409_v25  ;;  %v1517_v29 = vrot.slane %v2740_v13, 1 }
 0x500   : > { %v1586_v3 = vsel %vm926_vm1, %v1491_v35, 0.0  ;;  %v1601_v0 = vsel %vm926_vm1, %v1492_v41, 0.0  ;;  %v1493_v21 = vmul.f32 %v1477_v62, %v2518_v48  ;;  %v1480_v33 = vsel %vm1448_vm5, %v1418_v20, %v1464_v60 }
 0x501   : > { %vm1446_vm6 = vcmp.gt.f32.partialorder %v1410_v28, 0.0  ;;  %v1462_v16 = vmul.f32 0.2, %v1410_v28  ;;  %v1431_v53 = vadd.f32 %v2717_v23, %v1968_v5  ;;  %v1508_v36 = vrot.slane %v2742_v57, 1  ;;  %v1969_v43 = vpop.f32.mrf.mxu0 }
 0x502   : > { %v1523_v27 = vadd.f32 %v1522_v56, %v1521_v14  ;;  %v1600_v31 = vadd.f32 %v1599_v1, %v1598_v34  ;;  %v1587_v37 = vadd.f32 %v1586_v3, %v1585_v2  ;;  %v1533_v15 = vrot.slane %v2744_v47, 2 }
 0x503   : > { %v1546_v6 = vsel %vm660_vm0, %v1495_v18, 0.0  ;;  %v1496_v35 = vmul.f32 %v1480_v33, %v2563_v40  ;;  %v1478_v32 = vsel %vm1446_vm6, %v1410_v28, %v1462_v16  ;;  %v1590_v48 = vsel %vm926_vm1, %v1495_v18, 0.0  ;;  %v1425_v10 = vpop.f32.mrf.mxu0 }
 0x504   : > { %v1494_v41 = vmul.f32 %v1478_v32, %v2532_v63  ;;  %vm1451_vm7 = vcmp.gt.f32.partialorder %v1431_v53, 0.0  ;;  %v1467_v44 = vmul.f32 0.2, %v1431_v53  ;;  %v1588_v46 = vsel %vm926_vm1, %v1493_v21, 0.0 }
 0x505   : > { %v1547_v45 = vsel %vm660_vm0, %v1496_v35, 0.0  ;;  %v1423_v49 = vadd.f32 %v2717_v23, %v1422_v11  ;;  %v1434_v42 = vadd.f32 %v2717_v23, %v1969_v43  ;;  %v1524_v24 = vrot.slane %v1523_v27, 2 }
 0x506   : > { %v1537_v39 = vsel %vm660_vm0, %v1493_v21, 0.0  ;;  %v1548_v50 = vadd.f32 %v1547_v45, %v1546_v6  ;;  %v1538_v40 = vsel %vm660_vm0, %v1494_v41, 0.0  ;;  %v1603_v63 = vsel %vm926_vm1, %v1494_v41, 0.0 }
 0x507   : > { %v1539_v54 = vadd.f32 %v1538_v40, %v1537_v39  ;;  %v1483_v7 = vsel %vm1451_vm7, %v1431_v53, %v1467_v44  ;;  %vm1449_vm8 = vcmp.gt.f32.partialorder %v1423_v49, 0.0  ;;  %v1589_v25 = vadd.f32 %v1588_v46, %v1587_v37 }
 0x508   : > { %v1549_v58 = vrot.slane %v1548_v50, 4  ;;  %v1602_v51 = vadd.f32 %v1601_v0, %v1600_v31  ;;  %v1465_v26 = vmul.f32 0.2, %v1423_v49  ;;  %vm1452_vm9 = vcmp.gt.f32.partialorder %v1434_v42, 0.0 }
 0x509   : > { %v1540_v30 = vrot.slane %v1539_v54, 4  ;;  %v1468_v61 = vmul.f32 0.2, %v1434_v42  ;;  %v1426_v59 = vadd.f32 %v2717_v23, %v1425_v10  ;;  %v1525_v20 = vadd.f32 %v1524_v24, %v1523_v27 }
 0x50a   : > { %v1604_v5 = vadd.f32 %v1603_v63, %v1602_v51  ;;  %v1499_v55 = vmul.f32 %v1483_v7, %v2582_v22  ;;  %v1481_v9 = vsel %vm1449_vm8, %v1423_v49, %v1465_v26  ;;  %v1550_v14 = vadd.f32 %v1549_v58, %v1548_v50 }
 0x50b   : > { %v1541_v17 = vadd.f32 %v1540_v30, %v1539_v54  ;;  %v1497_v4 = vmul.f32 %v1481_v9, %v2572_v52  ;;  %v1484_v34 = vsel %vm1452_vm9, %v1434_v42, %v1468_v61  ;;  %vm1450_vm10 = vcmp.gt.f32.partialorder %v1426_v59, 0.0 }
 0x50c   : > { %v1500_v19 = vmul.f32 %v1484_v34, %v2561_v38  ;;  %v1466_v2 = vmul.f32 0.2, %v1426_v59  ;;  %v1591_v8 = vadd.f32 %v1590_v48, %v1589_v25  ;;  %v1534_v56 = vadd.f32 %v1533_v15, %v2744_v47 }
 0x50d   : > { %v1605_v1 = vsel %vm926_vm1, %v1496_v35, 0.0  ;;  %v1542_v23 = vrot.slane %v1541_v17, 2  ;;  %v1592_v11 = vsel %vm926_vm1, %v1497_v4, 0.0  ;;  %v1564_v22 = vsel %vm660_vm0, %v1499_v55, 0.0 }
 0x50e   : > { %v1565_v18 = vsel %vm660_vm0, %v1500_v19, 0.0  ;;  %v1482_v62 = vsel %vm1450_vm10, %v1426_v59, %v1466_v2  ;;  %v1593_v52 = vadd.f32 %v1592_v11, %v1591_v8  ;;  %v1526_v60 = vrot.slane %v1525_v20, 1 }
 0x50f   : > { %v1566_v28 = vadd.f32 %v1565_v18, %v1564_v22  ;;  %v1498_v3 = vmul.f32 %v1482_v62, %v2538_v12  ;;  %v1594_v38 = vsel %vm926_vm1, %v1499_v55, 0.0  ;;  %v1551_v0 = vrot.slane %v1550_v14, 2 }
 0x510   : > { %v1543_v21 = vadd.f32 %v1542_v23, %v1541_v17  ;;  %v1595_v47 = vadd.f32 %v1594_v38, %v1593_v52  ;;  %v1606_v33 = vadd.f32 %v1605_v1, %v1604_v5  ;;  %v1555_v16 = vsel %vm660_vm0, %v1497_v4, 0.0 }
 0x511   : > { %v1567_v53 = vrot.slane %v1566_v28, 4  ;;  %v1556_v27 = vsel %vm660_vm0, %v1498_v3, 0.0  ;;  %v1607_v31 = vsel %vm926_vm1, %v1498_v3, 0.0  ;;  %v1509_v12 = vadd.f32 %v1508_v36, %v2742_v57 }
 0x512   : > { %v1557_v37 = vadd.f32 %v1556_v27, %v1555_v16  ;;  %1637 = vrot.lane.b32.xlu0 %v1595_v47, %s2223_s19  ;;  %v1608_v43 = vadd.f32 %v1607_v31, %v1606_v33  ;;  %v1609_v6 = vsel %vm926_vm1, %v1500_v19, 0.0  ;;  %v1527_v35 = vadd.f32 %v1526_v60, %v1525_v20 }
 0x513   : > { %v1568_v15 = vadd.f32 %v1567_v53, %v1566_v28  ;;  %v1544_v32 = vrot.slane %v1543_v21, 1  ;;  %v1518_v44 = vadd.f32 %v1517_v29, %v2740_v13  ;;  %v1535_v46 = vrot.slane %v1534_v56, 1 }
 0x514   : > { %v1558_v48 = vrot.slane %v1557_v37, 4  ;;  %v1610_v41 = vadd.f32 %v1609_v6, %v1608_v43  ;;  %v1552_v45 = vadd.f32 %v1551_v0, %v1550_v14  ;;  %vm1623_vm1 = vcmask 1043459  }
 0x515   : > { %v1569_v49 = vrot.slane %v1568_v15, 2  ;;  %v1620_v57 = vsel %vm1619_vm11, %v1518_v44, %v1509_v12  ;;  %v1545_v39 = vadd.f32 %v1544_v32, %v1543_v21  ;;  %v1536_v40 = vadd.f32 %v1535_v46, %v1534_v56 }
 0x516   : > { %v1559_v42 = vadd.f32 %v1558_v48, %v1557_v37  ;;  %1639 = vrot.lane.b32.xlu1 %v1610_v41, %s2223_s19  ;;  %v1622_v24 = vsel %vm1621_vm12, %v1527_v35, %v1620_v57  ;;  %v1553_v10 = vrot.slane %v1552_v45, 1  ;;  %vm1625_vm13 = vcmask 1044484  }
 0x517   : > { %v1570_v36 = vadd.f32 %v1569_v49, %v1568_v15  ;;  %v1624_v29 = vsel %vm1623_vm1, %v1536_v40, %v1622_v24  ;;  %vm1627_vm14 = vcmask 1045509   ;;  %vm1629_vm15 = vcmask 1046534  }
 0x518   : > { %v1560_v50 = vrot.slane %v1559_v42, 2  ;;  %v1626_v7 = vsel %vm1625_vm13, %v1545_v39, %v1624_v29  ;;  %v1554_v25 = vadd.f32 %v1553_v10, %v1552_v45  ;;  %vm1631_vm2 = vcmask 1047559  }
 0x519   : > { %v1571_v13 = vrot.slane %v1570_v36, 1 }
 0x51a   : > { %v1561_v54 = vadd.f32 %v1560_v50, %v1559_v42  ;;  %v1628_v26 = vsel %vm1627_vm14, %v1554_v25, %v1626_v7 }
 0x51b   : > { %v1572_v51 = vadd.f32 %v1571_v13, %v1570_v36 }
 0x51c   : > { %v1562_v63 = vrot.slane %v1561_v54, 1 }
 0x51e   : > { %v1563_v58 = vadd.f32 %v1562_v63, %v1561_v54 }
 0x520   : > { %v1630_v30 = vsel %vm1629_vm15, %v1563_v58, %v1628_v26 }
 0x521   : > { %v1632_v61 = vsel %vm1631_vm2, %v1572_v51, %v1630_v30 }
 0x522   : > { %1634 = vst.msk [vmem:[%s353_s17] sm:$0xff] %vm660_vm0, %v1632_v61 }
 0x523   : > { %2127 = shalt.err (!%p2124_p5)
}
 0x524   : > { %s2128_s9 = scalar_lea.hbm %s2797_s10, 128  ;;  %s2132_s30 = scalar_lea.hbm %s2875_s6, 256 }
 0x525   : > { %p2129_p9 = scmp.ne.s32.totalorder %s2797_s10, %s2128_s9  ;;  %p2133_p4 = scmp.lt.s32.totalorder %s2797_s10, %s2875_s6 }
 0x526   : > { %p2134_p6 = scmp.lt.s32.totalorder %s2132_s30, %s2128_s9 }
 0x527   : > { %p2130_p12 = pnand %p2129_p9, %p2895_p11 }
 0x528   : > { %p2135_p8 = por %p2134_p6, %p2133_p4 }
 0x529   : > { %p2131_p1 = pneg %p2130_p12 }
 0x52b   : > { %p2136_p3 = pnand %p2135_p8, %p2131_p1 }
 0x52d   : > { %2139 = shalt.err (!%p2136_p3)
}
 0x52e   : > { %1980 = dma.vmem_to_hbm [thread:$0]  (%p2895_p11), %s1665_s29, 128, %s2797_s10, %s1646_s11  }
 0x52f   : > { %s1838_s12 = sshll.u32 %s2375_s18, 4  ;;  %s1879_s20 = sshll.u32 %s2289_s28, 8 }
 0x530   : > { %s360_s16 = scalar_lea.vmem [#allocation8], %s1838_s12  ;;  %s2825_s9 = scalar_lea.hbm %s2876_s7, %s1879_s20 }
 0x531   : > { %s1677_s23 = sshll.u32 %s360_s16, 4  ;;  %s1651_s29 = scalar_lea.sflag [#allocation9], %s2375_s18  ;;  %s2819_s23 = int_to_ptr.vmem [resolvable:$true] %s1677_s23 }
 0x532   : > { %s2140_s10 = scalar_lea.vmem %s2819_s23, 256  ;;  %s2225_s28 = smov [#allocation8]  }
 0x533   : > { %p2141_p7 = scmp.ne.s32.totalorder %s2819_s23, %s2140_s10  ;;  %s2144_s11 = sshll.u32 %s2225_s28, 4  ;;  %s2145_s11 = int_to_ptr.vmem [resolvable:$false] %s2144_s11 }
 0x534   : > { %s2146_s19 = scalar_lea.vmem %s2145_s11, 512  ;;  %p2147_p13 = scmp.lt.s32.totalorder %s2819_s23, %s2145_s11 }
 0x535   : > { %p2142_p10 = pnand %p2141_p7, %p2895_p11  ;;  %p2148_p0 = scmp.lt.s32.totalorder %s2146_s19, %s2140_s10 }
 0x537   : > { %p2143_p2 = pneg %p2142_p10  ;;  %p2149_p5 = por %p2148_p0, %p2147_p13 }
 0x539   : > { %p2150_p9 = pnand %p2149_p5, %p2143_p2 }
 0x584   : > { %v1638_v59 = vpop.permute.xlu0 %1637 }
 0x585   : > { %1643 = vst.msk [vmem:[%s360_s16] sm:$0xff] %vm660_vm0, %v1638_v59 }
 0x588   : > { %v1640_v20 = vpop.permute.xlu1 %1639 }
 0x589   : > { %1644 = vst.msk [vmem:[%s360_s16 + $0x8] sm:$0xff] %vm660_vm0, %v1640_v20 }
 0x58a   : > { %2153 = shalt.err (!%p2150_p9)
}
 0x58b   : > { %s2154_s14 = scalar_lea.hbm %s2825_s9, 256  ;;  %s2158_s17 = scalar_lea.hbm %s2876_s7, 512 }
 0x58c   : > { %p2155_p12 = scmp.ne.s32.totalorder %s2825_s9, %s2154_s14  ;;  %p2159_p6 = scmp.lt.s32.totalorder %s2825_s9, %s2876_s7 }
 0x58d   : > { %p2160_p8 = scmp.lt.s32.totalorder %s2158_s17, %s2154_s14 }
 0x58e   : > { %p2156_p1 = pnand %p2155_p12, %p2895_p11 }
 0x58f   : > { %p2161_p3 = por %p2160_p8, %p2159_p6 }
 0x590   : > { %p2157_p4 = pneg %p2156_p1 }
 0x592   : > { %p2162_p7 = pnand %p2161_p3, %p2157_p4 }
 0x594   : > { %2165 = shalt.err (!%p2162_p7)
}
 0x595   : > { %s2226_s20 = smov 128   ;;  %s2227_s4 = smov 8  }
 0x596   : > { %1981 = dma.vmem_to_hbm [thread:$0]  (%p2895_p11), %s2819_s23, 256, %s2825_s9, %s1651_s29, %s2226_s20, %s2226_s20, %s2227_s4  }
 0x597 PF: > { %s1692_s21 = sand.u32 1, %s2200_s24   ;;  %p2896_p10 = scmp.ne.s32.totalorder %s2883_s8, 0 }
 0x598   : > { %p2897_p2 = scmp.ge.s32.totalorder %s2212_s27, 2  ;;  %s1693_s10 = scalar_lea.sflag [#allocation4], %s1692_s21 }
 0x59a   : > { %p1993_p13 = pnand %p2897_p2, %p2896_p10 }
 0x59c   : > { %p1994_p0 = pneg %p1993_p13 }
 0x59e   : > { %2191 = dma.done.wait (%p1994_p0), %s1693_s10, 128  }
 0x59f   : > { %2193 = vsyncadd (%p1994_p0), %s1693_s10, 4294967168  ;;  %s1702_s28 = scalar_lea.sflag [#allocation9], %s1692_s21 }
 0x5a0   : > { %2195 = dma.done.wait (%p1994_p0), %s1702_s28, 256  }
 0x5a1   : > { %2197 = vsyncadd (%p1994_p0), %s1702_s28, 4294967040  ;;  %s2898_s22 = sld [smem:[#allocation14_spill]]  ;;  %p25_p11 = scmp.ge.s32.totalorder %s2322_s13, 4  }
 0x5a2   : > { %s2899_s24 = smov %s2204_s25  ;;  %s2900_s25 = smov %s2208_s26 }
 0x5a3   : > { %s2902_s27 = smov %s2322_s13  ;;  %27 = sbr.rel (!%p25_p11) target bundleno = 10 (0xa), region = 119 }
 0x5a7   : > { %s2901_s26 = smov %s2898_s22 }
 0x5a8   :  { %1707 = vsyncpa [#allocation3], 1 }
 0x5a9   :  { %1709 = vsyncpa [#allocation3 + $0x1], 1 }
 0x5aa   :  { %1710 = vsyncpa [#allocation6], 1 }
 0x5ab   :  { %1711 = vsyncpa [#allocation4], 1 }
 0x5ac   :  { %1713 = vsyncpa [#allocation4 + $0x1], 1 }
 0x5ad   :  { %1714 = vsyncpa [#allocation9], 1 }
 0x5ae   :  { %1716 = vsyncpa [#allocation9 + $0x1], 1 }

</bundles_post_ra>
